<compile_context>
chip_gen: v7x
topology: tpu7x:2x2x1
jax: 0.10.0
libtpu: 0.0.40
codegen_flags: <defaults>
</compile_context>

<pallas_src>
import numpy as np
import jax
import jax.numpy as jnp
from jax.experimental import pallas as pl
from jax.experimental.pallas import tpu as pltpu  # noqa: F401  (kept for TPU-specific tuning hooks)


def encoder_kernel(patches_ref, w1_ref, b1_ref, w2_ref, b2_ref, w3_ref, b3_ref,
                   out_ref):
    # conv1 (block-diagonal weight): (B, P*K1) @ (P*K1, P*L) -> (B, P*L)
    y1 = jnp.dot(patches_ref[...], w1_ref[...],
                 preferred_element_type=jnp.float32)
    y1 = jnp.maximum(y1 + b1_ref[...], 0.0)

    # conv2 fused into a single matmul: (B, P*L) @ (P*L, L) -> (B, L)
    v2 = jnp.dot(y1, w2_ref[...], preferred_element_type=jnp.float32)
    v2 = jnp.maximum(v2 + b2_ref[...], 0.0)

    # Linear: (B, L) @ (L, L) + b3 -> (B, L)
    out_ref[...] = jnp.dot(v2, w3_ref[...],
                           preferred_element_type=jnp.float32) + b3_ref[...]


def prepare_encoder(params, image_hw):
    """One-time weight re-layout + static im2col index table (host side)."""
    w1, b1, w2, b2, w3, b3 = params
    H, W = image_hw
    L, C, KH, KW = w1.shape
    assert (KH, KW) == (3, 3)
    H1 = (H - KH) // 2 + 1                 # conv1: k=3, s=2
    W1 = (W - KW) // 2 + 1
    K2h, K2w = w2.shape[2], w2.shape[3]
    # conv2 (stride 1) must reduce the conv1 map to 1x1 for Flatten(start_dim=0)+Linear
    assert H1 - K2h + 1 == 1 and W1 - K2w + 1 == 1
    P = H1 * W1                            # conv1 output positions (16)
    K1 = C * KH * KW                       # 36

    # Static gather indices: patch p = (i, j) of conv1, element order (c, di, dj)
    # -- matches w1.reshape(L, C*KH*KW).
    idx = np.empty((P, K1), dtype=np.int32)
    p = 0
    for i in range(H1):
        for j in range(W1):
            k = 0
            for c in range(C):
                for di in range(KH):
                    for dj in range(KW):
                        idx[p, k] = c * (H * W) + (2 * i + di) * W + (2 * j + dj)
                        k += 1
            p += 1
    idx = jnp.asarray(idx.reshape(-1))                       # (P*K1,)

    w1f = w1.reshape(L, K1).T                                # (K1, L)
    # Block-diagonal conv1 weight: y1[b, p*L + l] = patches[b, p, :] @ w1f[:, l]
    w1_bd = jnp.kron(jnp.eye(P, dtype=w1.dtype), w1f)        # (P*K1, P*L) = (576, 512)
    b1_t = jnp.tile(b1.reshape(1, L), (1, P))                # (1, P*L)

    # conv2 as one matmul: w2_flat[p*L + l_in, l_out] = w2[l_out, l_in, ki, kj],
    # with p = ki*W1 + kj.
    w2_flat = jnp.transpose(w2, (2, 3, 1, 0)).reshape(P * L, L)   # (512, 32)
    b2_r = b2.reshape(1, L)
    w3_t = w3.T                                              # (L, L)
    b3_r = b3.reshape(1, L)

    return dict(idx=idx, w1=w1_bd, b1=b1_t, w2=w2_flat, b2=b2_r,
                w3=w3_t, b3=b3_r, P=P, K1=K1, L=L, C=C, H=H, W=W)


def encoder_forward_batched(xb, prep):
    """xb: (B, C, H, W) float32 -> (B, L). One pallas_call, three fused matmuls."""
    B = xb.shape[0]
    L = prep["L"]
    # Per-call glue: a single gather builds all im2col patches at once.
    patches = xb.reshape(B, -1)[:, prep["idx"]]              # (B, P*K1)

    # No grid: whole arrays as single VMEM blocks (total footprint ~1.3 MiB).
    # TODO(synk): for large B, tile the batch axis with a 1-D grid and
    # dimension_semantics=("parallel",) to shard across v7x's two TensorCores.
    return pl.pallas_call(
        encoder_kernel,
        out_shape=jax.ShapeDtypeStruct((B, L), jnp.float32),
    )(patches, prep["w1"], prep["b1"], prep["w2"], prep["b2"],
      prep["w3"], prep["b3"])


def encoder_forward(x, prep):
    """Unbatched forward matching the PyTorch module: x (C, H, W) -> (L,)."""
    return encoder_forward_batched(x[None], prep)[0]


def encoder_ref(x, params):
    """Pure-JAX reference matching PyTorch semantics."""
    w1, b1, w2, b2, w3, b3 = params
    dn = ('NCHW', 'OIHW', 'NCHW')
    y = jax.lax.conv_general_dilated(x[None], w1, (2, 2), 'VALID',
                                     dimension_numbers=dn)
    y = jnp.maximum(y + b1[None, :, None, None], 0.0)
    y = jax.lax.conv_general_dilated(y, w2, (1, 1), 'VALID',
                                     dimension_numbers=dn)
    y = jnp.maximum(y + b2[None, :, None, None], 0.0)
    v = y.reshape(-1)                       # Flatten(start_dim=0) -> (L,)
    return w3 @ v + b3                      # Linear(L, L)


if __name__ == "__main__":
    channel_size, latent_size = 4, 32
    H = W = 9                               # conv1 -> 4x4, conv2 -> 1x1

    key = jax.random.PRNGKey(0)
    kx, kb, k1, k2, k3, k4, k5, k6 = jax.random.split(key, 8)
    x = jax.random.normal(kx, (channel_size, H, W), jnp.float32)

    # deterministic synthetic parameters (PyTorch-shaped)
    w1 = 0.1 * jax.random.normal(k1, (latent_size, channel_size, 3, 3), jnp.float32)
    b1 = 0.1 * jax.random.normal(k2, (latent_size,), jnp.float32)
    w2 = 0.1 * jax.random.normal(k3, (latent_size, latent_size, 4, 4), jnp.float32)
    b2 = 0.1 * jax.random.normal(k4, (latent_size,), jnp.float32)
    w3 = 0.1 * jax.random.normal(k5, (latent_size, latent_size), jnp.float32)
    b3 = 0.1 * jax.random.normal(k6, (latent_size,), jnp.float32)
    params = (w1, b1, w2, b2, w3, b3)

    prep = prepare_encoder(params, (H, W))

    # Unbatched path (exact PyTorch-module semantics).
    out = jax.block_until_ready(encoder_forward(x, prep))
    ref = jax.block_until_ready(encoder_ref(x, params))
    np.testing.assert_allclose(np.asarray(out), np.asarray(ref),
                               rtol=5e-2, atol=5e-2)

    # Batched throughput path: 8 samples through one pallas_call.
    xb = jax.random.normal(kb, (8, channel_size, H, W), jnp.float32)
    outb = jax.block_until_ready(encoder_forward_batched(xb, prep))
    refb = jax.block_until_ready(jax.vmap(lambda xi: encoder_ref(xi, params))(xb))
    np.testing.assert_allclose(np.asarray(outb), np.asarray(refb),
                               rtol=5e-2, atol=5e-2)

    print("KERNEL_OK")
</pallas_src>

<mosaic_0001>
module attributes {stable_mosaic.version = 11 : i64} {
  func.func @encoder_kernel(%arg0: memref<1x576xf32, #tpu.memory_space<vmem>>, %arg1: memref<576x512xf32, #tpu.memory_space<vmem>>, %arg2: memref<1x512xf32, #tpu.memory_space<vmem>>, %arg3: memref<512x32xf32, #tpu.memory_space<vmem>>, %arg4: memref<1x32xf32, #tpu.memory_space<vmem>>, %arg5: memref<32x32xf32, #tpu.memory_space<vmem>>, %arg6: memref<1x32xf32, #tpu.memory_space<vmem>>, %arg7: memref<1x32xf32, #tpu.memory_space<vmem>>) attributes {dimension_semantics = [], scalar_prefetch = 0 : i64, scratch_operands = 0 : i64, tpu.core_type = #tpu.core_type<tc>} {
    %c0 = arith.constant 0 : index
    %c0_0 = arith.constant 0 : index
    %0 = vector.load %arg0[%c0, %c0_0] : memref<1x576xf32, #tpu.memory_space<vmem>>, vector<1x576xf32>
    %c0_1 = arith.constant 0 : index
    %c0_2 = arith.constant 0 : index
    %1 = vector.load %arg1[%c0_1, %c0_2] : memref<576x512xf32, #tpu.memory_space<vmem>>, vector<576x512xf32>
    %cst = arith.constant dense<0.000000e+00> : vector<1x512xf32>
    %2 = tpu.matmul %0, %1, %cst {dimension_numbers = #tpu.dot_dimension_numbers<[1], [0], [0], [1], [0, 0, 1, 1], [], []>} : vector<1x576xf32>, vector<576x512xf32>, vector<1x512xf32> -> vector<1x512xf32>
    %c0_3 = arith.constant 0 : index
    %c0_4 = arith.constant 0 : index
    %3 = vector.load %arg2[%c0_3, %c0_4] : memref<1x512xf32, #tpu.memory_space<vmem>>, vector<1x512xf32>
    %4 = arith.addf %2, %3 : vector<1x512xf32>
    %cst_5 = arith.constant 0.000000e+00 : f32
    %5 = vector.broadcast %cst_5 : f32 to vector<1x512xf32>
    %6 = arith.maximumf %4, %5 : vector<1x512xf32>
    %c0_6 = arith.constant 0 : index
    %c0_7 = arith.constant 0 : index
    %7 = vector.load %arg3[%c0_6, %c0_7] : memref<512x32xf32, #tpu.memory_space<vmem>>, vector<512x32xf32>
    %cst_8 = arith.constant dense<0.000000e+00> : vector<1x32xf32>
    %8 = tpu.matmul %6, %7, %cst_8 {dimension_numbers = #tpu.dot_dimension_numbers<[1], [0], [0], [1], [0, 0, 1, 1], [], []>} : vector<1x512xf32>, vector<512x32xf32>, vector<1x32xf32> -> vector<1x32xf32>
    %c0_9 = arith.constant 0 : index
    %c0_10 = arith.constant 0 : index
    %9 = vector.load %arg4[%c0_9, %c0_10] : memref<1x32xf32, #tpu.memory_space<vmem>>, vector<1x32xf32>
    %10 = arith.addf %8, %9 : vector<1x32xf32>
    %cst_11 = arith.constant 0.000000e+00 : f32
    %11 = vector.broadcast %cst_11 : f32 to vector<1x32xf32>
    %12 = arith.maximumf %10, %11 : vector<1x32xf32>
    %c0_12 = arith.constant 0 : index
    %c0_13 = arith.constant 0 : index
    %13 = vector.load %arg5[%c0_12, %c0_13] : memref<32x32xf32, #tpu.memory_space<vmem>>, vector<32x32xf32>
    %cst_14 = arith.constant dense<0.000000e+00> : vector<1x32xf32>
    %14 = tpu.matmul %12, %13, %cst_14 {dimension_numbers = #tpu.dot_dimension_numbers<[1], [0], [0], [1], [0, 0, 1, 1], [], []>} : vector<1x32xf32>, vector<32x32xf32>, vector<1x32xf32> -> vector<1x32xf32>
    %c0_15 = arith.constant 0 : index
    %c0_16 = arith.constant 0 : index
    %15 = vector.load %arg6[%c0_15, %c0_16] : memref<1x32xf32, #tpu.memory_space<vmem>>, vector<1x32xf32>
    %16 = arith.addf %14, %15 : vector<1x32xf32>
    %c0_17 = arith.constant 0 : index
    %c0_18 = arith.constant 0 : index
    %17 = vector.load %arg7[%c0_17, %c0_18] : memref<1x32xf32, #tpu.memory_space<vmem>>, vector<1x32xf32>
    tpu.vector_store %arg7[%c0_17, %c0_18], %16 {strides = array<i32>} : memref<1x32xf32, #tpu.memory_space<vmem>>, vector<1x32xf32>,
    return
  }
}

</mosaic_0001>

<bundles_post_ra>
// kernel: tpu_custom_call.1
= control target key start
LH: loop header
LB: loop body
LE: loop exit
PB: predicated region body
PF: predicated region fallthrough
CT: control target
= control target key end

     0   :  { %12 = vsyncpa [#allocation3], 0  ;;  %s2181_s0 = inlined_call_operand.hbm [shape: f32[1,576], index: 0, kind: input, shape index: {}]   ;;  %s2182_s1 = inlined_call_operand.hbm [shape: f32[576,512], index: 1, kind: input, shape index: {}]   ;;  %s2183_s2 = inlined_call_operand.hbm [shape: f32[1,512], index: 2, kind: input, shape index: {}]   ;;  %s2184_s3 = inlined_call_operand.vmem [shape: f32[512,32], index: 3, kind: input, shape index: {}]   ;;  %s2185_s4 = inlined_call_operand.hbm [shape: f32[1,32], index: 4, kind: input, shape index: {}]   ;;  %s2186_s5 = inlined_call_operand.hbm [shape: f32[32,32], index: 5, kind: input, shape index: {}]   ;;  %s2187_s6 = inlined_call_operand.hbm [shape: f32[1,32], index: 6, kind: input, shape index: {}]   ;;  %s2188_s7 = inlined_call_operand.hbm [shape: f32[1,32], index: 7, kind: output, shape index: {}]  }
   0x1   :  { %13 = vsyncpa [#allocation6], 0 }
   0x2   :  { %14 = vsyncpa [#allocation9], 0 }
   0x3   :  { %15 = vsyncpa [#allocation12], 0 }
   0x4   :  { %16 = vsyncpa [#allocation4], 0  ;;  %s1812_s24 = smov [#allocation5]   ;;  %s1648_s28 = scalar_lea.hbm %s2182_s1, 36864 }
   0x5   :  { %s32_s25 = sshll.u32 %s1812_s24, 4  ;;  %p1649_p0 = scmp.ne.s32.totalorder %s2182_s1, %s1648_s28  ;;  %s33_s25 = int_to_ptr.vmem [resolvable:$true] %s32_s25 }
   0x6   :  { %p1652_p1 = scmp.lt.u32.totalorder %s1648_s28, %s2182_s1 }
   0x8   :  { %p1654_p2 = pnand %p1652_p1, %p1649_p0 }
   0xa   :  { %1657 = shalt.err (!%p1654_p2)
}
   0xb   :  { %s1658_s10 = scalar_lea.vmem %s33_s25, 36864  ;;  %p1663_p4 = scmp.lt.s32.totalorder %s33_s25, %s33_s25 }
   0xc   :  { %p1659_p3 = scmp.ne.s32.totalorder %s33_s25, %s1658_s10  ;;  %p1664_p5 = scmp.lt.s32.totalorder %s1658_s10, %s1658_s10 }
   0xe   :  { %p1665_p6 = por %p1664_p5, %p1663_p4 }
  0x10   :  { %p1666_p7 = pnand %p1665_p6, %p1659_p3 }
  0x12   :  { %1669 = shalt.err (!%p1666_p7)
}
  0x13   :  { %s1813_s11 = smov 512   ;;  %s1814_s12 = smov 32  }
  0x14   :  { %38 = dma.hbm_to_vmem [thread:$0]  %s2182_s1, 36864, %s33_s25, [#allocation6], %s1813_s11, %s1813_s11, %s1814_s12  }
  0x15   :  { %s1815_s15 = smov [#allocation8]   ;;  %s1816_s17 = smov [#allocation2]  }
  0x16   :  { %s57_s16 = sshll.u32 %s1815_s15, 4  ;;  %s23_s18 = sshll.u32 %s1816_s17, 4  ;;  %s58_s16 = int_to_ptr.vmem [resolvable:$true] %s57_s16  ;;  %s24_s18 = int_to_ptr.vmem [resolvable:$true] %s23_s18 }
  0x17   :  { %s1670_s21 = scalar_lea.hbm %s2185_s4, 16 }
  0x18   :  { %p1671_p8 = scmp.ne.s32.totalorder %s2185_s4, %s1670_s21  ;;  %p1674_p9 = scmp.lt.u32.totalorder %s1670_s21, %s2185_s4 }
  0x1a   :  { %p1676_p10 = pnand %p1674_p9, %p1671_p8 }
  0x1c   :  { %1679 = shalt.err (!%p1676_p10)
}
  0x1d   :  { %s1680_s1 = scalar_lea.vmem %s58_s16, 16  ;;  %s1684_s25 = scalar_lea.vmem %s58_s16, 32 }
  0x1e   :  { %p1681_p11 = scmp.ne.s32.totalorder %s58_s16, %s1680_s1  ;;  %p1685_p12 = scmp.lt.s32.totalorder %s58_s16, %s58_s16 }
  0x1f   :  { %p1686_p13 = scmp.lt.s32.totalorder %s1684_s25, %s1680_s1 }
  0x21   :  { %p1687_p0 = por %p1686_p13, %p1685_p12 }
  0x23   :  { %p1688_p1 = pnand %p1687_p0, %p1681_p11 }
  0x25   :  { %1691 = shalt.err (!%p1688_p1)
}
  0x26   :  { %60 = dma.hbm_to_vmem [thread:$0]  %s2185_s4, 16, %s58_s16, [#allocation9]  }
  0x27   :  { %s1692_s8 = scalar_lea.hbm %s2181_s0, 80 }
  0x28   :  { %p1693_p2 = scmp.ne.s32.totalorder %s2181_s0, %s1692_s8  ;;  %p1696_p3 = scmp.lt.u32.totalorder %s1692_s8, %s2181_s0 }
  0x2a   :  { %p1698_p4 = pnand %p1696_p3, %p1693_p2 }
  0x2c   :  { %1701 = shalt.err (!%p1698_p4)
}
  0x2d   :  { %s1702_s13 = scalar_lea.vmem %s24_s18, 80  ;;  %s1706_s14 = scalar_lea.vmem %s24_s18, 96 }
  0x2e   :  { %p1703_p5 = scmp.ne.s32.totalorder %s24_s18, %s1702_s13  ;;  %p1707_p6 = scmp.lt.s32.totalorder %s24_s18, %s24_s18 }
  0x2f   :  { %p1708_p7 = scmp.lt.s32.totalorder %s1706_s14, %s1702_s13 }
  0x31   :  { %p1709_p8 = por %p1708_p7, %p1707_p6 }
  0x33   :  { %p1710_p9 = pnand %p1709_p8, %p1703_p5 }
  0x35   :  { %1713 = shalt.err (!%p1710_p9)
}
  0x36   :  { %26 = dma.hbm_to_vmem [thread:$0]  %s2181_s0, 80, %s24_s18, [#allocation3]  }
  0x37   :  { %s1817_s16 = smov [#allocation7]   ;;  %s1818_s19 = smov [#allocation10]  }
  0x38   :  { %s45_s17 = sshll.u32 %s1817_s16, 4  ;;  %s66_s20 = sshll.u32 %s1818_s19, 4  ;;  %s46_s17 = int_to_ptr.vmem [resolvable:$true] %s45_s17  ;;  %s67_s20 = int_to_ptr.vmem [resolvable:$true] %s66_s20 }
  0x39   :  { %s1714_s23 = scalar_lea.hbm %s2183_s2, 64 }
  0x3a   :  { %p1715_p10 = scmp.ne.s32.totalorder %s2183_s2, %s1714_s23  ;;  %p1718_p11 = scmp.lt.u32.totalorder %s1714_s23, %s2183_s2 }
  0x3c   :  { %p1720_p12 = pnand %p1718_p11, %p1715_p10 }
  0x3e   :  { %1723 = shalt.err (!%p1720_p12)
}
  0x3f   :  { %s1724_s0 = scalar_lea.vmem %s46_s17, 64  ;;  %p1729_p0 = scmp.lt.s32.totalorder %s46_s17, %s46_s17 }
  0x40   :  { %p1725_p13 = scmp.ne.s32.totalorder %s46_s17, %s1724_s0  ;;  %p1730_p1 = scmp.lt.s32.totalorder %s1724_s0, %s1724_s0 }
  0x42   :  { %p1731_p2 = por %p1730_p1, %p1729_p0 }
  0x44   :  { %p1732_p3 = pnand %p1731_p2, %p1725_p13 }
  0x46   :  { %1735 = shalt.err (!%p1732_p3)
}
  0x47   :  { %48 = dma.hbm_to_vmem [thread:$0]  %s2183_s2, 64, %s46_s17, [#allocation6]  }
  0x48   :  { %s1736_s30 = scalar_lea.hbm %s2186_s5, 512 }
  0x49   :  { %p1737_p4 = scmp.ne.s32.totalorder %s2186_s5, %s1736_s30  ;;  %p1740_p5 = scmp.lt.u32.totalorder %s1736_s30, %s2186_s5 }
  0x4b   :  { %p1742_p6 = pnand %p1740_p5, %p1737_p4 }
  0x4d   :  { %1745 = shalt.err (!%p1742_p6)
}
  0x4e   :  { %s1746_s12 = scalar_lea.vmem %s67_s20, 512  ;;  %p1751_p8 = scmp.lt.s32.totalorder %s67_s20, %s67_s20 }
  0x4f   :  { %p1747_p7 = scmp.ne.s32.totalorder %s67_s20, %s1746_s12  ;;  %p1752_p9 = scmp.lt.s32.totalorder %s1746_s12, %s1746_s12 }
  0x51   :  { %p1753_p10 = por %p1752_p9, %p1751_p8 }
  0x53   :  { %p1754_p11 = pnand %p1753_p10, %p1747_p7 }
  0x55   :  { %1757 = shalt.err (!%p1754_p11)
}
  0x56   :  { %s1819_s2 = smov 128   ;;  %s1820_s13 = smov 8  }
  0x57   :  { %72 = dma.hbm_to_vmem [thread:$0]  %s2186_s5, 512, %s67_s20, [#allocation9], %s1819_s2, %s1819_s2, %s1820_s13  }
  0x58   :  { %s1821_s15 = smov [#allocation11]   ;;  %s1758_s21 = scalar_lea.hbm %s2187_s6, 16 }
  0x59   :  { %s79_s16 = sshll.u32 %s1821_s15, 4  ;;  %p1759_p12 = scmp.ne.s32.totalorder %s2187_s6, %s1758_s21  ;;  %s80_s16 = int_to_ptr.vmem [resolvable:$true] %s79_s16 }
  0x5a   :  { %p1762_p13 = scmp.lt.u32.totalorder %s1758_s21, %s2187_s6 }
  0x5c   :  { %p1764_p0 = pnand %p1762_p13, %p1759_p12 }
  0x5e   :  { %1767 = shalt.err (!%p1764_p0)
}
  0x5f   :  { %s1768_s1 = scalar_lea.vmem %s80_s16, 16  ;;  %s1772_s5 = scalar_lea.vmem %s80_s16, 32 }
  0x60   :  { %p1769_p1 = scmp.ne.s32.totalorder %s80_s16, %s1768_s1  ;;  %p1773_p2 = scmp.lt.s32.totalorder %s80_s16, %s80_s16 }
  0x61   :  { %p1774_p3 = scmp.lt.s32.totalorder %s1772_s5, %s1768_s1 }
  0x63   :  { %p1775_p4 = por %p1774_p3, %p1773_p2 }
  0x65   :  { %p1776_p5 = pnand %p1775_p4, %p1769_p1 }
  0x67   :  { %1779 = shalt.err (!%p1776_p5)
}
  0x68   :  { %82 = dma.hbm_to_vmem [thread:$0]  %s2187_s6, 16, %s80_s16, [#allocation12]  }
  0x69   :  { %1802 = dma.done.wait [#allocation3], 80  }
  0x6a   :  { %1803 = vsyncadd [#allocation3], 4294967216 }
  0x6b   :  { %1804 = dma.done.wait [#allocation6], 36928  }
  0x6c   :  { %1805 = vsyncadd [#allocation6], 4294930368 }
  0x6d   :  { %1806 = dma.done.wait [#allocation9], 528  }
  0x6e   :  { %1807 = vsyncadd [#allocation9], 4294966768 }
  0x6f   :  { %1808 = dma.done.wait [#allocation12], 16  }
  0x70   :  { %1809 = vsyncadd [#allocation12], 4294967280  ;;  %v103_v0 = vld [vmem:[#allocation5 + $0x8] sm:$0xff]  ;;  %v105_v2 = vld [vmem:[#allocation5 + $0x18] sm:$0xff]  ;;  %vm437_vm0 = vcmask 523264   ;;  %vm1824_vm1 = vmmov 0  }
  0x71   :  { %v107_v1 = vld [vmem:[#allocation5 + $0x28] sm:$0xff]  ;;  %v109_v4 = vld [vmem:[#allocation5 + $0x38] sm:$0xff]  ;;  %v102_v5 = vld [vmem:[#allocation5] sm:$0xff]  ;;  %vm1081_vm2 = vcmask 261120   ;;  %vm1155_vm3 = vcmask 253952  }
  0x72   :  { %v1264_v3 = vpack.c.bf16 %v107_v1, %v103_v0  ;;  %v106_v6 = vld [vmem:[#allocation5 + $0x20] sm:$0xff]  ;;  %v1408_v7 = vpack.c.bf16 %v109_v4, %v105_v2  ;;  %v104_v9 = vld [vmem:[#allocation5 + $0x10] sm:$0xff]  ;;  %v111_v11 = vld [vmem:[#allocation5 + $0x48] sm:$0xff] }
  0x73   :  { %v1266_v8 = vpack.c.bf16 %v106_v6, %v102_v5  ;;  %v108_v10 = vld [vmem:[#allocation5 + $0x30] sm:$0xff]  ;;  %v115_v13 = vld [vmem:[#allocation5 + $0x68] sm:$0xff]  ;;  %v113_v14 = vld [vmem:[#allocation5 + $0x58] sm:$0xff] }
  0x74   :  { %1265 = vmatprep.subr.bf16.mxu0 %v1264_v3  ;;  %v1410_v12 = vpack.c.bf16 %v108_v10, %v104_v9  ;;  %v117_v15 = vld [vmem:[#allocation5 + $0x78] sm:$0xff]  ;;  %1409 = vmatprep.subr.bf16.mxu1 %v1408_v7  ;;  %v1268_v16 = vpack.c.bf16 %v115_v13, %v111_v11  ;;  %v110_v18 = vld [vmem:[#allocation5 + $0x40] sm:$0xff]  ;;  %v112_v20 = vld [vmem:[#allocation5 + $0x50] sm:$0xff] }
  0x75   :  { %1267 = vmatpush1.bf16.msra.mxu0 %v1266_v8  ;;  %v1412_v17 = vpack.c.bf16 %v117_v15, %v113_v14  ;;  %v114_v19 = vld [vmem:[#allocation5 + $0x60] sm:$0xff]  ;;  %v116_v22 = vld [vmem:[#allocation5 + $0x70] sm:$0xff]  ;;  %v119_v23 = vld [vmem:[#allocation5 + $0x88] sm:$0xff] }
  0x76   :  { %1411 = vmatpush1.bf16.msra.mxu1 %v1410_v12  ;;  %v1270_v21 = vpack.c.bf16 %v114_v19, %v110_v18  ;;  %v123_v24 = vld [vmem:[#allocation5 + $0xa8] sm:$0xff]  ;;  %1269 = vmatprep.subr.bf16.mxu0 %v1268_v16  ;;  %v1414_v25 = vpack.c.bf16 %v116_v22, %v112_v20  ;;  %v121_v27 = vld [vmem:[#allocation5 + $0x98] sm:$0xff]  ;;  %v118_v29 = vld [vmem:[#allocation5 + $0x80] sm:$0xff] }
  0x77   :  { %1413 = vmatprep.subr.bf16.mxu1 %v1412_v17  ;;  %v1272_v26 = vpack.c.bf16 %v123_v24, %v119_v23  ;;  %v125_v28 = vld [vmem:[#allocation5 + $0xb8] sm:$0xff]  ;;  %v122_v31 = vld [vmem:[#allocation5 + $0xa0] sm:$0xff]  ;;  %v120_v32 = vld [vmem:[#allocation5 + $0x90] sm:$0xff] }
  0x78   :  { %v1416_v30 = vpack.c.bf16 %v125_v28, %v121_v27  ;;  %v124_v33 = vld [vmem:[#allocation5 + $0xb0] sm:$0xff]  ;;  %v1274_v34 = vpack.c.bf16 %v122_v31, %v118_v29  ;;  %v127_v35 = vld [vmem:[#allocation5 + $0xc8] sm:$0xff]  ;;  %v129_v37 = vld [vmem:[#allocation5 + $0xd8] sm:$0xff] }
  0x79   :  { %1271 = vmatpush1.bf16.msra.mxu0 %v1270_v21  ;;  %v131_v36 = vld [vmem:[#allocation5 + $0xe8] sm:$0xff]  ;;  %v1418_v38 = vpack.c.bf16 %v124_v33, %v120_v32  ;;  %v133_v40 = vld [vmem:[#allocation5 + $0xf8] sm:$0xff]  ;;  %v126_v41 = vld [vmem:[#allocation5 + $0xc0] sm:$0xff] }
  0x7a   :  { %1415 = vmatpush1.bf16.msra.mxu1 %v1414_v25  ;;  %1273 = vmatprep.subr.bf16.mxu0 %v1272_v26  ;;  %v1276_v39 = vpack.c.bf16 %v131_v36, %v127_v35  ;;  %v130_v42 = vld [vmem:[#allocation5 + $0xe0] sm:$0xff]  ;;  %v1420_v43 = vpack.c.bf16 %v133_v40, %v129_v37  ;;  %v128_v44 = vld [vmem:[#allocation5 + $0xd0] sm:$0xff]  ;;  %v135_v46 = vld [vmem:[#allocation5 + $0x108] sm:$0xff] }
  0x7b   :  { %1417 = vmatprep.subr.bf16.mxu1 %v1416_v30  ;;  %v132_v45 = vld [vmem:[#allocation5 + $0xf0] sm:$0xff]  ;;  %v139_v47 = vld [vmem:[#allocation5 + $0x128] sm:$0xff]  ;;  %v137_v48 = vld [vmem:[#allocation5 + $0x118] sm:$0xff]  ;;  %v1278_v50 = vpack.c.bf16 %v130_v42, %v126_v41 }
  0x7c   :  { %v141_v49 = vld [vmem:[#allocation5 + $0x138] sm:$0xff]  ;;  %v1422_v51 = vpack.c.bf16 %v132_v45, %v128_v44  ;;  %v1280_v52 = vpack.c.bf16 %v139_v47, %v135_v46  ;;  %v134_v53 = vld [vmem:[#allocation5 + $0x100] sm:$0xff]  ;;  %v136_v55 = vld [vmem:[#allocation5 + $0x110] sm:$0xff]  ;;  %v392_v46 = vlaneseq }
  0x7d   :  { %1275 = vmatpush1.bf16.msra.mxu0 %v1274_v34  ;;  %v138_v54 = vld [vmem:[#allocation5 + $0x120] sm:$0xff]  ;;  %v1424_v56 = vpack.c.bf16 %v141_v49, %v137_v48  ;;  %v140_v57 = vld [vmem:[#allocation5 + $0x130] sm:$0xff]  ;;  %v143_v58 = vld [vmem:[#allocation5 + $0x148] sm:$0xff] }
  0x7e   :  { %1419 = vmatpush1.bf16.msra.mxu1 %v1418_v38  ;;  %1277 = vmatprep.subr.bf16.mxu0 %v1276_v39  ;;  %v147_v59 = vld [vmem:[#allocation5 + $0x168] sm:$0xff]  ;;  %v145_v60 = vld [vmem:[#allocation5 + $0x158] sm:$0xff]  ;;  %v1282_v62 = vpack.c.bf16 %v138_v54, %v134_v53  ;;  %v1426_v63 = vpack.c.bf16 %v140_v57, %v136_v55  ;;  %v142_v1 = vld [vmem:[#allocation5 + $0x140] sm:$0xff] }
  0x7f   :  { %1421 = vmatprep.subr.bf16.mxu1 %v1420_v43  ;;  %v149_v61 = vld [vmem:[#allocation5 + $0x178] sm:$0xff]  ;;  %v1284_v0 = vpack.c.bf16 %v147_v59, %v143_v58  ;;  %v146_v2 = vld [vmem:[#allocation5 + $0x160] sm:$0xff]  ;;  %v144_v3 = vld [vmem:[#allocation5 + $0x150] sm:$0xff]  ;;  %v1938_v59 = vshrl.u32 %v392_v46, 7 }
  0x80   :  { %v1428_v4 = vpack.c.bf16 %v149_v61, %v145_v60  ;;  %v148_v5 = vld [vmem:[#allocation5 + $0x170] sm:$0xff]  ;;  %v151_v6 = vld [vmem:[#allocation5 + $0x188] sm:$0xff]  ;;  %v153_v8 = vld [vmem:[#allocation5 + $0x198] sm:$0xff]  ;;  %v1286_v10 = vpack.c.bf16 %v146_v2, %v142_v1 }
  0x81   :  { %1279 = vmatpush1.bf16.msra.mxu0 %v1278_v50  ;;  %v155_v7 = vld [vmem:[#allocation5 + $0x1a8] sm:$0xff]  ;;  %v157_v9 = vld [vmem:[#allocation5 + $0x1b8] sm:$0xff]  ;;  %v1430_v11 = vpack.c.bf16 %v148_v5, %v144_v3  ;;  %v150_v13 = vld [vmem:[#allocation5 + $0x180] sm:$0xff] }
  0x82   :  { %1423 = vmatpush1.bf16.msra.mxu1 %v1422_v51  ;;  %1281 = vmatprep.subr.bf16.mxu0 %v1280_v52  ;;  %v1288_v12 = vpack.c.bf16 %v155_v7, %v151_v6  ;;  %v154_v14 = vld [vmem:[#allocation5 + $0x1a0] sm:$0xff]  ;;  %v152_v15 = vld [vmem:[#allocation5 + $0x190] sm:$0xff]  ;;  %v1432_v16 = vpack.c.bf16 %v157_v9, %v153_v8  ;;  %v159_v18 = vld [vmem:[#allocation5 + $0x1c8] sm:$0xff]  ;;  %v398_v8 = vsub.s32 1, %v1938_v59 }
  0x83   :  { %1425 = vmatprep.subr.bf16.mxu1 %v1424_v56  ;;  %v156_v17 = vld [vmem:[#allocation5 + $0x1b0] sm:$0xff]  ;;  %v163_v19 = vld [vmem:[#allocation5 + $0x1e8] sm:$0xff]  ;;  %v161_v20 = vld [vmem:[#allocation5 + $0x1d8] sm:$0xff]  ;;  %v1290_v22 = vpack.c.bf16 %v154_v14, %v150_v13 }
  0x84   :  { %v165_v21 = vld [vmem:[#allocation5 + $0x1f8] sm:$0xff]  ;;  %v1434_v23 = vpack.c.bf16 %v156_v17, %v152_v15  ;;  %v1292_v24 = vpack.c.bf16 %v163_v19, %v159_v18  ;;  %v158_v25 = vld [vmem:[#allocation5 + $0x1c0] sm:$0xff]  ;;  %v160_v27 = vld [vmem:[#allocation5 + $0x1d0] sm:$0xff] }
  0x85   :  { %1283 = vmatpush1.bf16.msra.mxu0 %v1282_v62  ;;  %v162_v26 = vld [vmem:[#allocation5 + $0x1e0] sm:$0xff]  ;;  %v1436_v28 = vpack.c.bf16 %v165_v21, %v161_v20  ;;  %v164_v29 = vld [vmem:[#allocation5 + $0x1f0] sm:$0xff]  ;;  %v167_v30 = vld [vmem:[#allocation5 + $0x208] sm:$0xff] }
  0x86   :  { %1427 = vmatpush1.bf16.msra.mxu1 %v1426_v63  ;;  %1285 = vmatprep.subr.bf16.mxu0 %v1284_v0  ;;  %v171_v31 = vld [vmem:[#allocation5 + $0x228] sm:$0xff]  ;;  %v169_v32 = vld [vmem:[#allocation5 + $0x218] sm:$0xff]  ;;  %v1294_v34 = vpack.c.bf16 %v162_v26, %v158_v25  ;;  %v1438_v35 = vpack.c.bf16 %v164_v29, %v160_v27  ;;  %v166_v37 = vld [vmem:[#allocation5 + $0x200] sm:$0xff] }
  0x87   :  { %1429 = vmatprep.subr.bf16.mxu1 %v1428_v4  ;;  %v173_v33 = vld [vmem:[#allocation5 + $0x238] sm:$0xff]  ;;  %v1296_v36 = vpack.c.bf16 %v171_v31, %v167_v30  ;;  %v170_v38 = vld [vmem:[#allocation5 + $0x220] sm:$0xff]  ;;  %v168_v39 = vld [vmem:[#allocation5 + $0x210] sm:$0xff] }
  0x88   :  { %v1440_v40 = vpack.c.bf16 %v173_v33, %v169_v32  ;;  %v172_v41 = vld [vmem:[#allocation5 + $0x230] sm:$0xff]  ;;  %v175_v42 = vld [vmem:[#allocation5 + $0x248] sm:$0xff]  ;;  %v177_v44 = vld [vmem:[#allocation5 + $0x258] sm:$0xff]  ;;  %v1298_v47 = vpack.c.bf16 %v170_v38, %v166_v37 }
  0x89   :  { %1287 = vmatpush1.bf16.msra.mxu0 %v1286_v10  ;;  %v179_v43 = vld [vmem:[#allocation5 + $0x268] sm:$0xff]  ;;  %v181_v45 = vld [vmem:[#allocation5 + $0x278] sm:$0xff]  ;;  %v1442_v48 = vpack.c.bf16 %v172_v41, %v168_v39  ;;  %v174_v50 = vld [vmem:[#allocation5 + $0x240] sm:$0xff] }
  0x8a   :  { %1431 = vmatpush1.bf16.msra.mxu1 %v1430_v11  ;;  %1289 = vmatprep.subr.bf16.mxu0 %v1288_v12  ;;  %v1300_v49 = vpack.c.bf16 %v179_v43, %v175_v42  ;;  %v178_v51 = vld [vmem:[#allocation5 + $0x260] sm:$0xff]  ;;  %v176_v52 = vld [vmem:[#allocation5 + $0x250] sm:$0xff]  ;;  %v1444_v53 = vpack.c.bf16 %v181_v45, %v177_v44  ;;  %v183_v55 = vld [vmem:[#allocation5 + $0x288] sm:$0xff]  ;;  %v410_v11 = vsub.s32 4, %v1938_v59 }
  0x8b   :  { %1433 = vmatprep.subr.bf16.mxu1 %v1432_v16  ;;  %v180_v54 = vld [vmem:[#allocation5 + $0x270] sm:$0xff]  ;;  %v187_v56 = vld [vmem:[#allocation5 + $0x2a8] sm:$0xff]  ;;  %v185_v57 = vld [vmem:[#allocation5 + $0x298] sm:$0xff]  ;;  %v1302_v60 = vpack.c.bf16 %v178_v51, %v174_v50 }
  0x8c   :  { %v189_v58 = vld [vmem:[#allocation5 + $0x2b8] sm:$0xff]  ;;  %v1446_v61 = vpack.c.bf16 %v180_v54, %v176_v52  ;;  %v1304_v62 = vpack.c.bf16 %v187_v56, %v183_v55  ;;  %v182_v63 = vld [vmem:[#allocation5 + $0x280] sm:$0xff]  ;;  %v184_v1 = vld [vmem:[#allocation5 + $0x290] sm:$0xff] }
  0x8d   :  { %1291 = vmatpush1.bf16.msra.mxu0 %v1290_v22  ;;  %v186_v0 = vld [vmem:[#allocation5 + $0x2a0] sm:$0xff]  ;;  %v1448_v2 = vpack.c.bf16 %v189_v58, %v185_v57  ;;  %v188_v3 = vld [vmem:[#allocation5 + $0x2b0] sm:$0xff]  ;;  %v191_v4 = vld [vmem:[#allocation5 + $0x2c8] sm:$0xff] }
  0x8e   :  { %1435 = vmatpush1.bf16.msra.mxu1 %v1434_v23  ;;  %1293 = vmatprep.subr.bf16.mxu0 %v1292_v24  ;;  %v195_v5 = vld [vmem:[#allocation5 + $0x2e8] sm:$0xff]  ;;  %v193_v6 = vld [vmem:[#allocation5 + $0x2d8] sm:$0xff]  ;;  %v1306_v9 = vpack.c.bf16 %v186_v0, %v182_v63  ;;  %v190_v10 = vld [vmem:[#allocation5 + $0x2c0] sm:$0xff]  ;;  %v1450_v12 = vpack.c.bf16 %v188_v3, %v184_v1 }
  0x8f   :  { %1437 = vmatprep.subr.bf16.mxu1 %v1436_v28  ;;  %v197_v7 = vld [vmem:[#allocation5 + $0x2f8] sm:$0xff]  ;;  %v1308_v13 = vpack.c.bf16 %v195_v5, %v191_v4  ;;  %v194_v14 = vld [vmem:[#allocation5 + $0x2e0] sm:$0xff]  ;;  %v192_v15 = vld [vmem:[#allocation5 + $0x2d0] sm:$0xff] }
  0x90   :  { %v196_v16 = vld [vmem:[#allocation5 + $0x2f0] sm:$0xff]  ;;  %v1452_v17 = vpack.c.bf16 %v197_v7, %v193_v6  ;;  %v199_v18 = vld [vmem:[#allocation5 + $0x308] sm:$0xff]  ;;  %v1942_v20 = vld [vmem:[#allocation2] sm:$0x1f]  ;;  %v1310_v24 = vpack.c.bf16 %v194_v14, %v190_v10 }
  0x91   :  { %1295 = vmatpush1.bf16.msra.mxu0 %v1294_v34  ;;  %v203_v19 = vld [vmem:[#allocation5 + $0x328] sm:$0xff]  ;;  %v201_v21 = vld [vmem:[#allocation5 + $0x318] sm:$0xff]  ;;  %v399_v23 = vrot.slane %v1942_v20, %v398_v8  ;;  %v1948_v25 = vrot.slane %v1942_v20, %v410_v11  ;;  %v1454_v26 = vpack.c.bf16 %v196_v16, %v192_v15  ;;  %v198_v28 = vld [vmem:[#allocation5 + $0x300] sm:$0xff]  ;;  %v394_v11 = vsub.s32 0, %v1938_v59 }
  0x92   :  { %1439 = vmatpush1.bf16.msra.mxu1 %v1438_v35  ;;  %1297 = vmatprep.subr.bf16.mxu0 %v1296_v36  ;;  %v205_v22 = vld [vmem:[#allocation5 + $0x338] sm:$0xff]  ;;  %v1312_v27 = vpack.c.bf16 %v203_v19, %v199_v18  ;;  %v202_v29 = vld [vmem:[#allocation5 + $0x320] sm:$0xff]  ;;  %v200_v30 = vld [vmem:[#allocation5 + $0x310] sm:$0xff] }
  0x93   :  { %1441 = vmatprep.subr.bf16.mxu1 %v1440_v40  ;;  %v1456_v31 = vpack.c.bf16 %v205_v22, %v201_v21  ;;  %v204_v32 = vld [vmem:[#allocation5 + $0x330] sm:$0xff]  ;;  %v207_v33 = vld [vmem:[#allocation5 + $0x348] sm:$0xff]  ;;  %504 = vmatprep.mubr.f32.mxu0 %v399_v23  ;;  %v209_v35 = vld [vmem:[#allocation5 + $0x358] sm:$0xff]  ;;  %v1314_v37 = vpack.c.bf16 %v202_v29, %v198_v28 }
  0x94   :  { %v211_v34 = vld [vmem:[#allocation5 + $0x368] sm:$0xff]  ;;  %v213_v36 = vld [vmem:[#allocation5 + $0x378] sm:$0xff]  ;;  %717 = vmatprep.mubr.f32.mxu1 %v399_v23  ;;  %v1458_v38 = vpack.c.bf16 %v204_v32, %v200_v30  ;;  %v206_v40 = vld [vmem:[#allocation5 + $0x340] sm:$0xff]  ;;  %v406_v23 = vsub.s32 3, %v1938_v59 }
  0x95   :  { %1299 = vmatpush1.bf16.msra.mxu0 %v1298_v47  ;;  %v1316_v39 = vpack.c.bf16 %v211_v34, %v207_v33  ;;  %v210_v41 = vld [vmem:[#allocation5 + $0x360] sm:$0xff]  ;;  %v208_v42 = vld [vmem:[#allocation5 + $0x350] sm:$0xff]  ;;  %v1460_v43 = vpack.c.bf16 %v213_v36, %v209_v35  ;;  %v215_v45 = vld [vmem:[#allocation5 + $0x388] sm:$0xff] }
  0x96   :  { %1443 = vmatpush1.bf16.msra.mxu1 %v1442_v48  ;;  %1301 = vmatprep.subr.bf16.mxu0 %v1300_v49  ;;  %v212_v44 = vld [vmem:[#allocation5 + $0x370] sm:$0xff]  ;;  %v219_v46 = vld [vmem:[#allocation5 + $0x3a8] sm:$0xff]  ;;  %v217_v47 = vld [vmem:[#allocation5 + $0x398] sm:$0xff]  ;;  %v1318_v49 = vpack.c.bf16 %v210_v41, %v206_v40 }
  0x97   :  { %1445 = vmatprep.subr.bf16.mxu1 %v1444_v53  ;;  %v221_v48 = vld [vmem:[#allocation5 + $0x3b8] sm:$0xff]  ;;  %v1462_v50 = vpack.c.bf16 %v212_v44, %v208_v42  ;;  %v1320_v51 = vpack.c.bf16 %v219_v46, %v215_v45  ;;  %v214_v52 = vld [vmem:[#allocation5 + $0x380] sm:$0xff]  ;;  %v216_v54 = vld [vmem:[#allocation5 + $0x390] sm:$0xff] }
  0x98   :  { %v218_v53 = vld [vmem:[#allocation5 + $0x3a0] sm:$0xff]  ;;  %v1464_v55 = vpack.c.bf16 %v221_v48, %v217_v47  ;;  %v220_v56 = vld [vmem:[#allocation5 + $0x3b0] sm:$0xff]  ;;  %v223_v57 = vld [vmem:[#allocation5 + $0x3c8] sm:$0xff] }
  0x99   :  { %1303 = vmatpush1.bf16.msra.mxu0 %v1302_v60  ;;  %v227_v58 = vld [vmem:[#allocation5 + $0x3e8] sm:$0xff]  ;;  %v225_v60 = vld [vmem:[#allocation5 + $0x3d8] sm:$0xff]  ;;  %v1466_v63 = vpack.c.bf16 %v220_v56, %v216_v54  ;;  %v222_v1 = vld [vmem:[#allocation5 + $0x3c0] sm:$0xff] }
  0x9a   :  { %1447 = vmatpush1.bf16.msra.mxu1 %v1446_v61  ;;  %1305 = vmatprep.subr.bf16.mxu0 %v1304_v62  ;;  %v229_v61 = vld [vmem:[#allocation5 + $0x3f8] sm:$0xff]  ;;  %v1322_v62 = vpack.c.bf16 %v218_v53, %v214_v52  ;;  %v1324_v0 = vpack.c.bf16 %v227_v58, %v223_v57  ;;  %v224_v3 = vld [vmem:[#allocation5 + $0x3d0] sm:$0xff]  ;;  %v231_v6 = vld [vmem:[#allocation5 + $0x408] sm:$0xff] }
  0x9b   :  { %1449 = vmatprep.subr.bf16.mxu1 %v1448_v2  ;;  %v226_v2 = vld [vmem:[#allocation5 + $0x3e0] sm:$0xff]  ;;  %v1468_v4 = vpack.c.bf16 %v229_v61, %v225_v60  ;;  %v228_v5 = vld [vmem:[#allocation5 + $0x3f0] sm:$0xff]  ;;  %v235_v7 = vld [vmem:[#allocation5 + $0x428] sm:$0xff] }
  0x9c   :  { %v237_v10 = vld [vmem:[#allocation5 + $0x438] sm:$0xff]  ;;  %v1328_v14 = vpack.c.bf16 %v235_v7, %v231_v6  ;;  %v230_v15 = vld [vmem:[#allocation5 + $0x400] sm:$0xff]  ;;  %v236_v19 = vld [vmem:[#allocation5 + $0x430] sm:$0xff] }
  0x9d   :  { %1307 = vmatpush1.bf16.msra.mxu0 %v1306_v9  ;;  %v233_v9 = vld [vmem:[#allocation5 + $0x418] sm:$0xff]  ;;  %v234_v16 = vld [vmem:[#allocation5 + $0x420] sm:$0xff]  ;;  %v239_v21 = vld [vmem:[#allocation5 + $0x448] sm:$0xff] }
  0x9e   :  { %1451 = vmatpush1.bf16.msra.mxu1 %v1450_v12  ;;  %1309 = vmatprep.subr.bf16.mxu0 %v1308_v13  ;;  %v1326_v12 = vpack.c.bf16 %v226_v2, %v222_v1  ;;  %v1470_v13 = vpack.c.bf16 %v228_v5, %v224_v3  ;;  %v1472_v18 = vpack.c.bf16 %v237_v10, %v233_v9  ;;  %v243_v22 = vld [vmem:[#allocation5 + $0x468] sm:$0xff]  ;;  %v242_v32 = vld [vmem:[#allocation5 + $0x460] sm:$0xff]  ;;  %v240_v33 = vld [vmem:[#allocation5 + $0x450] sm:$0xff] }
  0x9f   :  { %1453 = vmatprep.subr.bf16.mxu1 %v1452_v17  ;;  %v232_v17 = vld [vmem:[#allocation5 + $0x410] sm:$0xff]  ;;  %v1330_v28 = vpack.c.bf16 %v234_v16, %v230_v15  ;;  %v1332_v30 = vpack.c.bf16 %v243_v22, %v239_v21  ;;  %v247_v36 = vld [vmem:[#allocation5 + $0x488] sm:$0xff]  ;;  %v253_v40 = vld [vmem:[#allocation5 + $0x4b8] sm:$0xff] }
  0xa0   :  { %v1474_v29 = vpack.c.bf16 %v236_v19, %v232_v17  ;;  %v244_v35 = vld [vmem:[#allocation5 + $0x470] sm:$0xff]  ;;  %v246_v44 = vld [vmem:[#allocation5 + $0x480] sm:$0xff]  ;;  %v261_v52 = vld [vmem:[#allocation5 + $0x4f8] sm:$0xff] }
  0xa1   :  { %1311 = vmatpush1.bf16.msra.mxu0 %v1310_v24  ;;  %v395_v24 = vrot.slane %v1942_v20, %v394_v11  ;;  %v1478_v42 = vpack.c.bf16 %v244_v35, %v240_v33  ;;  %v250_v45 = vld [vmem:[#allocation5 + $0x4a0] sm:$0xff]  ;;  %v248_v46 = vld [vmem:[#allocation5 + $0x490] sm:$0xff]  ;;  %v269_v1 = vld [vmem:[#allocation5 + $0x538] sm:$0xff] }
  0xa2   :  { %1455 = vmatpush1.bf16.msra.mxu1 %v1454_v26  ;;  %1313 = vmatprep.subr.bf16.mxu0 %v1312_v27  ;;  %v241_v26 = vld [vmem:[#allocation5 + $0x458] sm:$0xff]  ;;  %v252_v48 = vld [vmem:[#allocation5 + $0x4b0] sm:$0xff]  ;;  %v1338_v53 = vpack.c.bf16 %v250_v45, %v246_v44  ;;  %v254_v56 = vld [vmem:[#allocation5 + $0x4c0] sm:$0xff] }
  0xa3   :  { %1457 = vmatprep.subr.bf16.mxu1 %v1456_v31  ;;  %v245_v27 = vld [vmem:[#allocation5 + $0x478] sm:$0xff]  ;;  %v238_v31 = vld [vmem:[#allocation5 + $0x440] sm:$0xff]  ;;  %v1482_v54 = vpack.c.bf16 %v252_v48, %v248_v46  ;;  %v256_v58 = vld [vmem:[#allocation5 + $0x4d0] sm:$0xff] }
  0xa4   :  { %v1476_v34 = vpack.c.bf16 %v245_v27, %v241_v26  ;;  %v1334_v41 = vpack.c.bf16 %v242_v32, %v238_v31  ;;  %v258_v57 = vld [vmem:[#allocation5 + $0x4e0] sm:$0xff]  ;;  %v260_v61 = vld [vmem:[#allocation5 + $0x4f0] sm:$0xff]  ;;  %v277_v15 = vld [vmem:[#allocation5 + $0x578] sm:$0xff] }
  0xa5   :  { %1315 = vmatpush1.bf16.msra.mxu0 %v1314_v37  ;;  %v251_v37 = vld [vmem:[#allocation5 + $0x4a8] sm:$0xff]  ;;  %v1342_v2 = vpack.c.bf16 %v258_v57, %v254_v56  ;;  %v1486_v3 = vpack.c.bf16 %v260_v61, %v256_v58  ;;  %v262_v5 = vld [vmem:[#allocation5 + $0x500] sm:$0xff]  ;;  %v264_v7 = vld [vmem:[#allocation5 + $0x510] sm:$0xff] }
  0xa6   :  { %1459 = vmatpush1.bf16.msra.mxu1 %v1458_v38  ;;  %1317 = vmatprep.subr.bf16.mxu0 %v1316_v39  ;;  %v407_v38 = vrot.slane %v1942_v20, %v406_v23  ;;  %v249_v39 = vld [vmem:[#allocation5 + $0x498] sm:$0xff]  ;;  %v266_v6 = vld [vmem:[#allocation5 + $0x520] sm:$0xff]  ;;  %v268_v10 = vld [vmem:[#allocation5 + $0x530] sm:$0xff] }
  0xa7   :  { %1461 = vmatprep.subr.bf16.mxu1 %v1460_v43  ;;  %v1336_v43 = vpack.c.bf16 %v251_v37, %v247_v36  ;;  %v1480_v47 = vpack.c.bf16 %v253_v40, %v249_v39  ;;  %v1346_v16 = vpack.c.bf16 %v266_v6, %v262_v5  ;;  %v1490_v17 = vpack.c.bf16 %v268_v10, %v264_v7  ;;  %v270_v19 = vld [vmem:[#allocation5 + $0x540] sm:$0xff]  ;;  %v272_v22 = vld [vmem:[#allocation5 + $0x550] sm:$0xff]  ;;  %v279_v27 = vld [vmem:[#allocation5 + $0x588] sm:$0xff] }
  0xa8   :  { %v274_v21 = vld [vmem:[#allocation5 + $0x560] sm:$0xff]  ;;  %v276_v26 = vld [vmem:[#allocation5 + $0x570] sm:$0xff]  ;;  %v287_v39 = vld [vmem:[#allocation5 + $0x5c8] sm:$0xff] }
  0xa9   :  { %1319 = vmatpush1.bf16.msra.mxu0 %v1318_v49  ;;  %v255_v49 = vld [vmem:[#allocation5 + $0x4c8] sm:$0xff]  ;;  %v1350_v31 = vpack.c.bf16 %v274_v21, %v270_v19  ;;  %v1494_v32 = vpack.c.bf16 %v276_v26, %v272_v22  ;;  %v282_v35 = vld [vmem:[#allocation5 + $0x5a0] sm:$0xff]  ;;  %v280_v36 = vld [vmem:[#allocation5 + $0x590] sm:$0xff] }
  0xaa   :  { %1463 = vmatpush1.bf16.msra.mxu1 %v1462_v50  ;;  %1321 = vmatprep.subr.bf16.mxu0 %v1320_v51  ;;  %v259_v50 = vld [vmem:[#allocation5 + $0x4e8] sm:$0xff]  ;;  %v257_v51 = vld [vmem:[#allocation5 + $0x4d8] sm:$0xff]  ;;  %v286_v46 = vld [vmem:[#allocation5 + $0x5c0] sm:$0xff] }
  0xab   :  { %1465 = vmatprep.subr.bf16.mxu1 %v1464_v55  ;;  %v1340_v55 = vpack.c.bf16 %v259_v50, %v255_v49  ;;  %v1484_v60 = vpack.c.bf16 %v261_v52, %v257_v51  ;;  %v291_v40 = vld [vmem:[#allocation5 + $0x5e8] sm:$0xff]  ;;  %v288_v48 = vld [vmem:[#allocation5 + $0x5d0] sm:$0xff]  ;;  %v294_v58 = vld [vmem:[#allocation5 + $0x600] sm:$0xff] }
  0xac   :  { %v1356_v45 = vpack.c.bf16 %v291_v40, %v287_v39  ;;  %v292_v50 = vld [vmem:[#allocation5 + $0x5f0] sm:$0xff]  ;;  %v295_v51 = vld [vmem:[#allocation5 + $0x608] sm:$0xff]  ;;  %v302_v7 = vld [vmem:[#allocation5 + $0x640] sm:$0xff] }
  0xad   :  { %1323 = vmatpush1.bf16.msra.mxu0 %v1322_v62  ;;  %v263_v62 = vld [vmem:[#allocation5 + $0x508] sm:$0xff]  ;;  %v1502_v56 = vpack.c.bf16 %v292_v50, %v288_v48  ;;  %v296_v61 = vld [vmem:[#allocation5 + $0x610] sm:$0xff]  ;;  %v310_v22 = vld [vmem:[#allocation5 + $0x680] sm:$0xff] }
  0xae   :  { %1467 = vmatpush1.bf16.msra.mxu1 %v1466_v63  ;;  %1325 = vmatprep.subr.bf16.mxu0 %v1324_v0  ;;  %v267_v63 = vld [vmem:[#allocation5 + $0x528] sm:$0xff]  ;;  %v265_v0 = vld [vmem:[#allocation5 + $0x518] sm:$0xff]  ;;  %v304_v10 = vld [vmem:[#allocation5 + $0x650] sm:$0xff] }
  0xaf   :  { %1469 = vmatprep.subr.bf16.mxu1 %v1468_v4  ;;  %v1344_v4 = vpack.c.bf16 %v267_v63, %v263_v62  ;;  %v1488_v9 = vpack.c.bf16 %v269_v1, %v265_v0  ;;  %v299_v52 = vld [vmem:[#allocation5 + $0x628] sm:$0xff]  ;;  %v300_v63 = vld [vmem:[#allocation5 + $0x630] sm:$0xff]  ;;  %v326_v48 = vld [vmem:[#allocation5 + $0x700] sm:$0xff] }
  0xb0   :  { %v1360_v57 = vpack.c.bf16 %v299_v52, %v295_v51  ;;  %v303_v0 = vld [vmem:[#allocation5 + $0x648] sm:$0xff]  ;;  %v1506_v5 = vpack.c.bf16 %v300_v63, %v296_v61  ;;  %v312_v26 = vld [vmem:[#allocation5 + $0x690] sm:$0xff]  ;;  %v334_v61 = vld [vmem:[#allocation5 + $0x740] sm:$0xff] }
  0xb1   :  { %1327 = vmatpush1.bf16.msra.mxu0 %v1326_v12  ;;  %v271_v12 = vld [vmem:[#allocation5 + $0x548] sm:$0xff]  ;;  %v324_v40 = vld [vmem:[#allocation5 + $0x6f0] sm:$0xff] }
  0xb2   :  { %1471 = vmatpush1.bf16.msra.mxu1 %v1470_v13  ;;  %1329 = vmatprep.subr.bf16.mxu0 %v1328_v14  ;;  %v275_v13 = vld [vmem:[#allocation5 + $0x568] sm:$0xff]  ;;  %v273_v14 = vld [vmem:[#allocation5 + $0x558] sm:$0xff]  ;;  %v328_v50 = vld [vmem:[#allocation5 + $0x710] sm:$0xff] }
  0xb3   :  { %1473 = vmatprep.subr.bf16.mxu1 %v1472_v18  ;;  %v1348_v18 = vpack.c.bf16 %v275_v13, %v271_v12  ;;  %v307_v1 = vld [vmem:[#allocation5 + $0x668] sm:$0xff]  ;;  %v308_v13 = vld [vmem:[#allocation5 + $0x670] sm:$0xff] }
  0xb4   :  { %505 = vmatmul.mubr.f32.vlgmr.msra.gmra.mrb[0].mxu0 %v395_v24  ;;  %v1364_v6 = vpack.c.bf16 %v307_v1, %v303_v0  ;;  %v1510_v19 = vpack.c.bf16 %v308_v13, %v304_v10  ;;  %v332_v52 = vld [vmem:[#allocation5 + $0x730] sm:$0xff]  ;;  %v342_v10 = vld [vmem:[#allocation5 + $0x780] sm:$0xff] }
  0xb5   :  { %1331 = vmatpush1.bf16.msra.mxu0 %v1330_v28  ;;  %718 = vmatmul.mubr.f32.vlgmr.msra.gmra.mrb[0].mxu1 %v395_v24  ;;  %v1492_v24 = vpack.c.bf16 %v277_v15, %v273_v14  ;;  %v283_v28 = vld [vmem:[#allocation5 + $0x5a8] sm:$0xff]  ;;  %v336_v63 = vld [vmem:[#allocation5 + $0x750] sm:$0xff] }
  0xb6   :  { %1475 = vmatpush1.bf16.msra.mxu1 %v1474_v29  ;;  %1333 = vmatprep.subr.bf16.mxu0 %v1332_v30  ;;  %v281_v29 = vld [vmem:[#allocation5 + $0x598] sm:$0xff]  ;;  %v1352_v33 = vpack.c.bf16 %v283_v28, %v279_v27  ;;  %v311_v14 = vld [vmem:[#allocation5 + $0x688] sm:$0xff]  ;;  %v316_v28 = vld [vmem:[#allocation5 + $0x6b0] sm:$0xff] }
  0xb7   :  { %1477 = vmatprep.subr.bf16.mxu1 %v1476_v34  ;;  %575 = vmatprep.mubr.f32.mxu0 %v407_v38  ;;  %v285_v30 = vld [vmem:[#allocation5 + $0x5b8] sm:$0xff]  ;;  %v278_v34 = vld [vmem:[#allocation5 + $0x580] sm:$0xff]  ;;  %v315_v15 = vld [vmem:[#allocation5 + $0x6a8] sm:$0xff] }
  0xb8   :  { %788 = vmatprep.mubr.f32.mxu1 %v407_v38  ;;  %v1496_v37 = vpack.c.bf16 %v285_v30, %v281_v29  ;;  %v284_v38 = vld [vmem:[#allocation5 + $0x5b0] sm:$0xff]  ;;  %v1368_v21 = vpack.c.bf16 %v315_v15, %v311_v14  ;;  %v319_v29 = vld [vmem:[#allocation5 + $0x6c8] sm:$0xff] }
  0xb9   :  { %1335 = vmatpush1.bf16.msra.mxu0 %v1334_v41  ;;  %v289_v41 = vld [vmem:[#allocation5 + $0x5d8] sm:$0xff]  ;;  %v1498_v44 = vpack.c.bf16 %v284_v38, %v280_v36  ;;  %v323_v30 = vld [vmem:[#allocation5 + $0x6e8] sm:$0xff]  ;;  %v318_v36 = vld [vmem:[#allocation5 + $0x6c0] sm:$0xff] }
  0xba   :  { %1479 = vmatpush1.bf16.msra.mxu1 %v1478_v42  ;;  %1337 = vmatprep.subr.bf16.mxu0 %v1336_v43  ;;  %v293_v42 = vld [vmem:[#allocation5 + $0x5f8] sm:$0xff]  ;;  %v1354_v43 = vpack.c.bf16 %v282_v35, %v278_v34  ;;  %v1514_v34 = vpack.c.bf16 %v316_v28, %v312_v26  ;;  %v1372_v35 = vpack.c.bf16 %v323_v30, %v319_v29  ;;  %v320_v38 = vld [vmem:[#allocation5 + $0x6d0] sm:$0xff]  ;;  %v350_v26 = vld [vmem:[#allocation5 + $0x7c0] sm:$0xff] }
  0xbb   :  { %1481 = vmatprep.subr.bf16.mxu1 %v1480_v47  ;;  %v290_v47 = vld [vmem:[#allocation5 + $0x5e0] sm:$0xff]  ;;  %v1500_v49 = vpack.c.bf16 %v293_v42, %v289_v41  ;;  %v327_v41 = vld [vmem:[#allocation5 + $0x708] sm:$0xff]  ;;  %v340_v1 = vld [vmem:[#allocation5 + $0x770] sm:$0xff] }
  0xbc   :  { %v331_v42 = vld [vmem:[#allocation5 + $0x728] sm:$0xff]  ;;  %v344_v13 = vld [vmem:[#allocation5 + $0x790] sm:$0xff] }
  0xbd   :  { %1339 = vmatpush1.bf16.msra.mxu0 %v1338_v53  ;;  %v297_v53 = vld [vmem:[#allocation5 + $0x618] sm:$0xff]  ;;  %v348_v15 = vld [vmem:[#allocation5 + $0x7b0] sm:$0xff] }
  0xbe   :  { %1483 = vmatpush1.bf16.msra.mxu1 %v1482_v54  ;;  %1341 = vmatprep.subr.bf16.mxu0 %v1340_v55  ;;  %v301_v54 = vld [vmem:[#allocation5 + $0x638] sm:$0xff]  ;;  %v1358_v55 = vpack.c.bf16 %v290_v47, %v286_v46  ;;  %v1518_v46 = vpack.c.bf16 %v324_v40, %v320_v38  ;;  %v1376_v47 = vpack.c.bf16 %v331_v42, %v327_v41  ;;  %v352_v28 = vld [vmem:[#allocation5 + $0x7d0] sm:$0xff]  ;;  %v362_v40 = vld [vmem:[#allocation5 + $0x820] sm:$0xff] }
  0xbf   :  { %1485 = vmatprep.subr.bf16.mxu1 %v1484_v60  ;;  %v298_v60 = vld [vmem:[#allocation5 + $0x620] sm:$0xff]  ;;  %v1504_v62 = vpack.c.bf16 %v301_v54, %v297_v53  ;;  %v335_v53 = vld [vmem:[#allocation5 + $0x748] sm:$0xff]  ;;  %v356_v30 = vld [vmem:[#allocation5 + $0x7f0] sm:$0xff] }
  0xc0   :  { %v339_v54 = vld [vmem:[#allocation5 + $0x768] sm:$0xff]  ;;  %v360_v41 = vld [vmem:[#allocation5 + $0x810] sm:$0xff] }
  0xc1   :  { %1343 = vmatpush1.bf16.msra.mxu0 %v1342_v2  ;;  %v305_v2 = vld [vmem:[#allocation5 + $0x658] sm:$0xff] }
  0xc2   :  { %1487 = vmatpush1.bf16.msra.mxu1 %v1486_v3  ;;  %1345 = vmatprep.subr.bf16.mxu0 %v1344_v4  ;;  %v309_v3 = vld [vmem:[#allocation5 + $0x678] sm:$0xff]  ;;  %v1362_v4 = vpack.c.bf16 %v298_v60, %v294_v58  ;;  %v1522_v58 = vpack.c.bf16 %v332_v52, %v328_v50  ;;  %v1380_v60 = vpack.c.bf16 %v339_v54, %v335_v53  ;;  %v366_v52 = vld [vmem:[#allocation5 + $0x840] sm:$0xff]  ;;  %v368_v54 = vld [vmem:[#allocation5 + $0x850] sm:$0xff] }
  0xc3   :  { %1489 = vmatprep.subr.bf16.mxu1 %v1488_v9  ;;  %v306_v9 = vld [vmem:[#allocation5 + $0x660] sm:$0xff]  ;;  %v1508_v12 = vpack.c.bf16 %v309_v3, %v305_v2  ;;  %v343_v2 = vld [vmem:[#allocation5 + $0x788] sm:$0xff] }
  0xc4   :  { %v347_v3 = vld [vmem:[#allocation5 + $0x7a8] sm:$0xff]  ;;  %v370_v53 = vld [vmem:[#allocation5 + $0x860] sm:$0xff] }
  0xc5   :  { %1347 = vmatpush1.bf16.msra.mxu0 %v1346_v16  ;;  %v313_v16 = vld [vmem:[#allocation5 + $0x698] sm:$0xff] }
  0xc6   :  { %1491 = vmatpush1.bf16.msra.mxu1 %v1490_v17  ;;  %1349 = vmatprep.subr.bf16.mxu0 %v1348_v18  ;;  %v317_v17 = vld [vmem:[#allocation5 + $0x6b8] sm:$0xff]  ;;  %v1366_v18 = vpack.c.bf16 %v306_v9, %v302_v7  ;;  %v1526_v7 = vpack.c.bf16 %v340_v1, %v336_v63  ;;  %v1384_v9 = vpack.c.bf16 %v347_v3, %v343_v2  ;;  %v378_v1 = vld [vmem:[#allocation5 + $0x8a0] sm:$0xff]  ;;  %v376_v2 = vld [vmem:[#allocation5 + $0x890] sm:$0xff] }
  0xc7   :  { %1493 = vmatprep.subr.bf16.mxu1 %v1492_v24  ;;  %v314_v24 = vld [vmem:[#allocation5 + $0x6a0] sm:$0xff]  ;;  %v1512_v27 = vpack.c.bf16 %v317_v17, %v313_v16  ;;  %v351_v16 = vld [vmem:[#allocation5 + $0x7c8] sm:$0xff] }
  0xc8   :  { %v355_v17 = vld [vmem:[#allocation5 + $0x7e8] sm:$0xff] }
  0xc9   :  { %1351 = vmatpush1.bf16.msra.mxu0 %v1350_v31  ;;  %v321_v31 = vld [vmem:[#allocation5 + $0x6d8] sm:$0xff] }
  0xca   :  { %1495 = vmatpush1.bf16.msra.mxu1 %v1494_v32  ;;  %1353 = vmatprep.subr.bf16.mxu0 %v1352_v33  ;;  %v325_v32 = vld [vmem:[#allocation5 + $0x6f8] sm:$0xff]  ;;  %v1370_v33 = vpack.c.bf16 %v314_v24, %v310_v22  ;;  %v1530_v22 = vpack.c.bf16 %v348_v15, %v344_v13  ;;  %v1388_v24 = vpack.c.bf16 %v355_v17, %v351_v16  ;;  %v382_v15 = vld [vmem:[#allocation5 + $0x8c0] sm:$0xff]  ;;  %v384_v17 = vld [vmem:[#allocation5 + $0x8d0] sm:$0xff] }
  0xcb   :  { %1497 = vmatprep.subr.bf16.mxu1 %v1496_v37  ;;  %v322_v37 = vld [vmem:[#allocation5 + $0x6e0] sm:$0xff]  ;;  %v1516_v39 = vpack.c.bf16 %v325_v32, %v321_v31  ;;  %v359_v31 = vld [vmem:[#allocation5 + $0x808] sm:$0xff] }
  0xcc   :  { %v363_v32 = vld [vmem:[#allocation5 + $0x828] sm:$0xff]  ;;  %v386_v16 = vld [vmem:[#allocation5 + $0x8e0] sm:$0xff] }
  0xcd   :  { %1355 = vmatpush1.bf16.msra.mxu0 %v1354_v43  ;;  %v329_v43 = vld [vmem:[#allocation5 + $0x718] sm:$0xff]  ;;  %v1392_v38 = vpack.c.bf16 %v363_v32, %v359_v31  ;;  %v871_v31 = vld [vmem:[%s2184_s3 + $0x8] sm:$0xff] }
  0xce   :  { %1499 = vmatpush1.bf16.msra.mxu1 %v1498_v44  ;;  %1357 = vmatprep.subr.bf16.mxu0 %v1356_v45  ;;  %v333_v44 = vld [vmem:[#allocation5 + $0x738] sm:$0xff]  ;;  %v1374_v45 = vpack.c.bf16 %v322_v37, %v318_v36  ;;  %v1534_v37 = vpack.c.bf16 %v356_v30, %v352_v28 }
  0xcf   :  { %1501 = vmatprep.subr.bf16.mxu1 %v1500_v49  ;;  %v330_v49 = vld [vmem:[#allocation5 + $0x720] sm:$0xff]  ;;  %v1520_v51 = vpack.c.bf16 %v333_v44, %v329_v43  ;;  %v364_v43 = vld [vmem:[#allocation5 + $0x830] sm:$0xff]  ;;  %v367_v44 = vld [vmem:[#allocation5 + $0x848] sm:$0xff] }
  0xd0   :  { %v1538_v50 = vpack.c.bf16 %v364_v43, %v360_v41  ;;  %v870_v30 = vld [vmem:[%s2184_s3] sm:$0xff]  ;;  %v872_v43 = vld [vmem:[%s2184_s3 + $0x10] sm:$0xff] }
  0xd1   :  { %1359 = vmatpush1.bf16.msra.mxu0 %v1358_v55  ;;  %v337_v55 = vld [vmem:[#allocation5 + $0x758] sm:$0xff] }
  0xd2   :  { %1503 = vmatpush1.bf16.msra.mxu1 %v1502_v56  ;;  %1361 = vmatprep.subr.bf16.mxu0 %v1360_v57  ;;  %v341_v56 = vld [vmem:[#allocation5 + $0x778] sm:$0xff]  ;;  %v1378_v57 = vpack.c.bf16 %v330_v49, %v326_v48 }
  0xd3   :  { %1505 = vmatprep.subr.bf16.mxu1 %v1504_v62  ;;  %v338_v62 = vld [vmem:[#allocation5 + $0x760] sm:$0xff]  ;;  %v1524_v0 = vpack.c.bf16 %v341_v56, %v337_v55  ;;  %v373_v48 = vld [vmem:[#allocation5 + $0x878] sm:$0xff]  ;;  %v372_v56 = vld [vmem:[#allocation5 + $0x870] sm:$0xff] }
  0xd4   :  { %v902_v32 = vld [vmem:[%s2184_s3 + $0x100] sm:$0xff] }
  0xd5   :  { %1363 = vmatpush1.bf16.msra.mxu0 %v1362_v4  ;;  %v345_v4 = vld [vmem:[#allocation5 + $0x798] sm:$0xff] }
  0xd6   :  { %1507 = vmatpush1.bf16.msra.mxu1 %v1506_v5  ;;  %1365 = vmatprep.subr.bf16.mxu0 %v1364_v6  ;;  %v349_v5 = vld [vmem:[#allocation5 + $0x7b8] sm:$0xff]  ;;  %v1382_v6 = vpack.c.bf16 %v338_v62, %v334_v61  ;;  %v1542_v62 = vpack.c.bf16 %v372_v56, %v368_v54  ;;  %v875_v56 = vld [vmem:[%s2184_s3 + $0x28] sm:$0xff] }
  0xd7   :  { %1509 = vmatprep.subr.bf16.mxu1 %v1508_v12  ;;  %v346_v12 = vld [vmem:[#allocation5 + $0x7a0] sm:$0xff]  ;;  %v1528_v14 = vpack.c.bf16 %v349_v5, %v345_v4  ;;  %v381_v61 = vld [vmem:[#allocation5 + $0x8b8] sm:$0xff]  ;;  %v380_v4 = vld [vmem:[#allocation5 + $0x8b0] sm:$0xff] }
  0xd8   :  { %v383_v5 = vld [vmem:[#allocation5 + $0x8c8] sm:$0xff]  ;;  %v1546_v13 = vpack.c.bf16 %v380_v4, %v376_v2 }
  0xd9   :  { %1367 = vmatpush1.bf16.msra.mxu0 %v1366_v18  ;;  %v353_v18 = vld [vmem:[#allocation5 + $0x7d8] sm:$0xff]  ;;  %v876_v2 = vld [vmem:[%s2184_s3 + $0x30] sm:$0xff] }
  0xda   :  { %1511 = vmatpush1.bf16.msra.mxu1 %v1510_v19  ;;  %1369 = vmatprep.subr.bf16.mxu0 %v1368_v21  ;;  %v357_v19 = vld [vmem:[#allocation5 + $0x7f8] sm:$0xff]  ;;  %v1386_v21 = vpack.c.bf16 %v346_v12, %v342_v10  ;;  %v908_v4 = vld [vmem:[%s2184_s3 + $0x130] sm:$0xff] }
  0xdb   :  { %1513 = vmatprep.subr.bf16.mxu1 %v1512_v27  ;;  %v354_v27 = vld [vmem:[#allocation5 + $0x7e0] sm:$0xff]  ;;  %v1532_v29 = vpack.c.bf16 %v357_v19, %v353_v18  ;;  %v389_v10 = vld [vmem:[#allocation5 + $0x8f8] sm:$0xff]  ;;  %v388_v19 = vld [vmem:[#allocation5 + $0x8f0] sm:$0xff] }
  0xdc   :  { %v1390_v36 = vpack.c.bf16 %v354_v27, %v350_v26  ;;  %v919_v26 = vld [vmem:[%s2184_s3 + $0x188] sm:$0xff]  ;;  %v1406_v27 = vpack.c.bf16 %v386_v16, %v382_v15  ;;  %v1550_v28 = vpack.c.bf16 %v388_v19, %v384_v17  ;;  %v878_v17 = vld [vmem:[%s2184_s3 + $0x40] sm:$0xff] }
  0xdd   :  { %1371 = vmatpush1.bf16.msra.mxu0 %v1370_v33  ;;  %v361_v33 = vld [vmem:[#allocation5 + $0x818] sm:$0xff] }
  0xde   :  { %1515 = vmatpush1.bf16.msra.mxu1 %v1514_v34  ;;  %1373 = vmatprep.subr.bf16.mxu0 %v1372_v35  ;;  %v365_v34 = vld [vmem:[#allocation5 + $0x838] sm:$0xff]  ;;  %v402_v35 = vsub.s32 2, %v1938_v59 }
  0xdf   :  { %1517 = vmatprep.subr.bf16.mxu1 %v1516_v39  ;;  %v358_v39 = vld [vmem:[#allocation5 + $0x800] sm:$0xff]  ;;  %v1536_v42 = vpack.c.bf16 %v365_v34, %v361_v33 }
  0xe0   :  { %v1394_v49 = vpack.c.bf16 %v362_v40, %v358_v39  ;;  %v903_v34 = vld [vmem:[%s2184_s3 + $0x108] sm:$0xff]  ;;  %v921_v39 = vld [vmem:[%s2184_s3 + $0x198] sm:$0xff]  ;;  %v1554_v40 = vpack.c.bf16 %v871_v31, %v870_v30  ;;  %v910_v19 = vld [vmem:[%s2184_s3 + $0x140] sm:$0xff] }
  0xe1   :  { %1375 = vmatpush1.bf16.msra.mxu0 %v1374_v45  ;;  %v371_v45 = vld [vmem:[#allocation5 + $0x868] sm:$0xff]  ;;  %v1586_v41 = vpack.c.bf16 %v903_v34, %v902_v32 }
  0xe2   :  { %1519 = vmatpush1.bf16.msra.mxu1 %v1518_v46  ;;  %1377 = vmatprep.subr.bf16.mxu0 %v1376_v47  ;;  %v403_v46 = vrot.slane %v1942_v20, %v402_v35  ;;  %v369_v47 = vld [vmem:[#allocation5 + $0x858] sm:$0xff]  ;;  %v1398_v20 = vpack.c.bf16 %v370_v53, %v366_v52  ;;  %v880_v32 = vld [vmem:[%s2184_s3 + $0x50] sm:$0xff] }
  0xe3   :  { %1521 = vmatprep.subr.bf16.mxu1 %v1520_v51  ;;  %v1396_v51 = vpack.c.bf16 %v371_v45, %v367_v44  ;;  %v1540_v55 = vpack.c.bf16 %v373_v48, %v369_v47  ;;  %v873_v44 = vld [vmem:[%s2184_s3 + $0x18] sm:$0xff]  ;;  %v904_v45 = vld [vmem:[%s2184_s3 + $0x110] sm:$0xff]  ;;  %v890_v48 = vld [vmem:[%s2184_s3 + $0xa0] sm:$0xff] }
  0xe4   :  { %v905_v47 = vld [vmem:[%s2184_s3 + $0x118] sm:$0xff]  ;;  %v1558_v52 = vpack.c.bf16 %v873_v44, %v872_v43  ;;  %v912_v34 = vld [vmem:[%s2184_s3 + $0x150] sm:$0xff] }
  0xe5   :  { %1379 = vmatpush1.bf16.msra.mxu0 %v1378_v57  ;;  %v375_v57 = vld [vmem:[#allocation5 + $0x888] sm:$0xff]  ;;  %v1590_v53 = vpack.c.bf16 %v905_v47, %v904_v45 }
  0xe6   :  { %1523 = vmatpush1.bf16.msra.mxu1 %v1522_v58  ;;  %1381 = vmatprep.subr.bf16.mxu0 %v1380_v60  ;;  %v379_v58 = vld [vmem:[#allocation5 + $0x8a8] sm:$0xff]  ;;  %v377_v60 = vld [vmem:[#allocation5 + $0x898] sm:$0xff] }
  0xe7   :  { %1525 = vmatprep.subr.bf16.mxu1 %v1524_v0  ;;  %v1400_v63 = vpack.c.bf16 %v379_v58, %v375_v57  ;;  %v374_v0 = vld [vmem:[#allocation5 + $0x880] sm:$0xff]  ;;  %v1544_v3 = vpack.c.bf16 %v381_v61, %v377_v60  ;;  %v892_v60 = vld [vmem:[%s2184_s3 + $0xb0] sm:$0xff]  ;;  %v893_v61 = vld [vmem:[%s2184_s3 + $0xb8] sm:$0xff] }
  0xe8   :  { %v1402_v12 = vpack.c.bf16 %v378_v1, %v374_v0  ;;  %v906_v57 = vld [vmem:[%s2184_s3 + $0x120] sm:$0xff]  ;;  %v907_v58 = vld [vmem:[%s2184_s3 + $0x128] sm:$0xff]  ;;  %v1564_v1 = vpack.c.bf16 %v893_v61, %v892_v60  ;;  %v916_v61 = vld [vmem:[%s2184_s3 + $0x170] sm:$0xff] }
  0xe9   :  { %1383 = vmatpush1.bf16.msra.mxu0 %v1382_v6  ;;  %v387_v6 = vld [vmem:[#allocation5 + $0x8e8] sm:$0xff]  ;;  %v1594_v0 = vpack.c.bf16 %v907_v58, %v906_v57 }
  0xea   :  { %1527 = vmatpush1.bf16.msra.mxu1 %v1526_v7  ;;  %1385 = vmatprep.subr.bf16.mxu0 %v1384_v9  ;;  %v1822_v7 = vmov 0.0   ;;  %v385_v9 = vld [vmem:[#allocation5 + $0x8d8] sm:$0xff]  ;;  %v883_v47 = vld [vmem:[%s2184_s3 + $0x68] sm:$0xff]  ;;  %v884_v57 = vld [vmem:[%s2184_s3 + $0x70] sm:$0xff] }
  0xeb   :  { %1529 = vmatprep.subr.bf16.mxu1 %v1528_v14  ;;  %v1404_v14 = vpack.c.bf16 %v387_v6, %v383_v5  ;;  %v1548_v18 = vpack.c.bf16 %v389_v10, %v385_v9  ;;  %v909_v6 = vld [vmem:[%s2184_s3 + $0x138] sm:$0xff]  ;;  %v894_v9 = vld [vmem:[%s2184_s3 + $0xc0] sm:$0xff]  ;;  %v895_v10 = vld [vmem:[%s2184_s3 + $0xc8] sm:$0xff] }
  0xec   :  { %v1598_v15 = vpack.c.bf16 %v909_v6, %v908_v4  ;;  %v1568_v16 = vpack.c.bf16 %v895_v10, %v894_v9 }
  0xed   :  { %1387 = vmatpush1.bf16.msra.mxu0 %v1386_v21  ;;  %v886_v21 = vld [vmem:[%s2184_s3 + $0x80] sm:$0xff] }
  0xee   :  { %1531 = vmatpush1.bf16.msra.mxu1 %v1530_v22  ;;  %1389 = vmatprep.subr.bf16.mxu0 %v1388_v24  ;;  %v887_v22 = vld [vmem:[%s2184_s3 + $0x88] sm:$0xff]  ;;  %v918_v24 = vld [vmem:[%s2184_s3 + $0x180] sm:$0xff] }
  0xef   :  { %1533 = vmatprep.subr.bf16.mxu1 %v1532_v29  ;;  %v1552_v29 = vpack.c.bf16 %v887_v22, %v886_v21  ;;  %v1584_v33 = vpack.c.bf16 %v919_v26, %v918_v24  ;;  %v911_v22 = vld [vmem:[%s2184_s3 + $0x148] sm:$0xff]  ;;  %v896_v24 = vld [vmem:[%s2184_s3 + $0xd0] sm:$0xff]  ;;  %v897_v26 = vld [vmem:[%s2184_s3 + $0xd8] sm:$0xff] }
  0xf0   :  { %v1602_v30 = vpack.c.bf16 %v911_v22, %v910_v19  ;;  %v1572_v31 = vpack.c.bf16 %v897_v26, %v896_v24  ;;  %v1079_v19 = vld [vmem:[#allocation10 + $0x18] sm:$0xff] }
  0xf1   :  { %1391 = vmatpush1.bf16.msra.mxu0 %v1390_v36  ;;  %v888_v36 = vld [vmem:[%s2184_s3 + $0x90] sm:$0xff]  ;;  %v934_v26 = vld [vmem:[#allocation8] sm:$0x1] }
  0xf2   :  { %1535 = vmatpush1.bf16.msra.mxu1 %v1534_v37  ;;  %1393 = vmatprep.subr.bf16.mxu0 %v1392_v38  ;;  %v889_v37 = vld [vmem:[%s2184_s3 + $0x98] sm:$0xff]  ;;  %v920_v38 = vld [vmem:[%s2184_s3 + $0x190] sm:$0xff] }
  0xf3   :  { %1537 = vmatprep.subr.bf16.mxu1 %v1536_v42  ;;  %v1556_v42 = vpack.c.bf16 %v889_v37, %v888_v36  ;;  %v913_v37 = vld [vmem:[%s2184_s3 + $0x158] sm:$0xff] }
  0xf4   :  { %576 = vmatmul.mubr.f32.vlgmr.msra.gmra.mrb[0].mxu0 %v403_v46  ;;  %v1606_v43 = vpack.c.bf16 %v913_v37, %v912_v34  ;;  %v1080_v34 = vld [vmem:[#allocation11] sm:$0x1] }
  0xf5   :  { %1395 = vmatpush1.bf16.msra.mxu0 %v1394_v49  ;;  %789 = vmatmul.mubr.f32.vlgmr.msra.gmra.mrb[0].mxu1 %v403_v46  ;;  %v1588_v46 = vpack.c.bf16 %v921_v39, %v920_v38  ;;  %v891_v49 = vld [vmem:[%s2184_s3 + $0xa8] sm:$0xff]  ;;  %v898_v38 = vld [vmem:[%s2184_s3 + $0xe0] sm:$0xff] }
  0xf6   :  { %1539 = vmatpush1.bf16.msra.mxu1 %v1538_v50  ;;  %1397 = vmatprep.subr.bf16.mxu0 %v1396_v51  ;;  %v922_v50 = vld [vmem:[%s2184_s3 + $0x1a0] sm:$0xff]  ;;  %v923_v51 = vld [vmem:[%s2184_s3 + $0x1a8] sm:$0xff]  ;;  %v1560_v54 = vpack.c.bf16 %v891_v49, %v890_v48 }
  0xf7   :  { %1541 = vmatprep.subr.bf16.mxu1 %v1540_v55  ;;  %646 = vmatprep.mubr.f32.mxu0 %v1822_v7  ;;  %v874_v55 = vld [vmem:[%s2184_s3 + $0x20] sm:$0xff]  ;;  %v899_v39 = vld [vmem:[%s2184_s3 + $0xe8] sm:$0xff] }
  0xf8   :  { %859 = vmatprep.mubr.f32.mxu1 %v1822_v7  ;;  %v1576_v44 = vpack.c.bf16 %v899_v39, %v898_v38  ;;  %v914_v48 = vld [vmem:[%s2184_s3 + $0x160] sm:$0xff] }
  0xf9   :  { %1399 = vmatpush1.bf16.msra.mxu0 %v1398_v20  ;;  %v924_v20 = vld [vmem:[%s2184_s3 + $0x1b0] sm:$0xff] }
  0xfa   :  { %1543 = vmatpush1.bf16.msra.mxu1 %v1542_v62  ;;  %1401 = vmatprep.subr.bf16.mxu0 %v1400_v63  ;;  %v925_v62 = vld [vmem:[%s2184_s3 + $0x1b8] sm:$0xff]  ;;  %v1562_v63 = vpack.c.bf16 %v875_v56, %v874_v55 }
  0xfb   :  { %1545 = vmatprep.subr.bf16.mxu1 %v1544_v3  ;;  %v877_v3 = vld [vmem:[%s2184_s3 + $0x38] sm:$0xff]  ;;  %v1596_v5 = vpack.c.bf16 %v925_v62, %v924_v20 }
  0xfc   :  { %v933_v56 = vld [vmem:[%s2184_s3 + $0x1f8] sm:$0xff] }
  0xfd   :  { %1403 = vmatpush1.bf16.msra.mxu0 %v1402_v12  ;;  %v926_v12 = vld [vmem:[%s2184_s3 + $0x1c0] sm:$0xff]  ;;  %v917_v20 = vld [vmem:[%s2184_s3 + $0x178] sm:$0xff] }
  0xfe   :  { %1547 = vmatpush1.bf16.msra.mxu1 %v1546_v13  ;;  %1405 = vmatprep.subr.bf16.mxu0 %v1404_v14  ;;  %v927_v13 = vld [vmem:[%s2184_s3 + $0x1c8] sm:$0xff]  ;;  %v1566_v14 = vpack.c.bf16 %v877_v3, %v876_v2  ;;  %v1614_v62 = vpack.c.bf16 %v917_v20, %v916_v61 }
  0xff   :  { %1549 = vmatprep.subr.bf16.mxu1 %v1548_v18  ;;  %v879_v18 = vld [vmem:[%s2184_s3 + $0x48] sm:$0xff]  ;;  %v1600_v21 = vpack.c.bf16 %v927_v13, %v926_v12 }
 0x101   :  { %1407 = vmatpush1.bf16.msra.mxu0 %v1406_v27  ;;  %v928_v27 = vld [vmem:[%s2184_s3 + $0x1d0] sm:$0xff] }
 0x102   :  { %1551 = vmatpush1.bf16.msra.mxu1 %v1550_v28  ;;  %1553 = vmatprep.subr.bf16.mxu0 %v1552_v29  ;;  %v929_v28 = vld [vmem:[%s2184_s3 + $0x1d8] sm:$0xff]  ;;  %v1570_v29 = vpack.c.bf16 %v879_v18, %v878_v17 }
 0x103   :  { %1585 = vmatprep.subr.bf16.mxu1 %v1584_v33  ;;  %v881_v33 = vld [vmem:[%s2184_s3 + $0x58] sm:$0xff]  ;;  %v1604_v36 = vpack.c.bf16 %v929_v28, %v928_v27 }
 0x104   :  { %1175 = vmatmul.mubr.msk.f32.vlgmr.msra.gmra.mrb[0].mxu0 %vm437_vm0, %v1948_v25  ;;  %v1078_v18 = vld [vmem:[#allocation10 + $0x10] sm:$0xff] }
 0x105   :  { %1176 = vmatmul.mubr.msk.f32.vlgmr.msra.gmra.mrb[0].mxu1 %vm437_vm0, %v1948_v25  ;;  %1555 = vmatpush3.bf16.msra.mxu0 %v1554_v40  ;;  %v1592_v25 = vpack.c.bf16 %v923_v51, %v922_v50  ;;  %v930_v40 = vld [vmem:[%s2184_s3 + $0x1e0] sm:$0xff]  ;;  %v915_v50 = vld [vmem:[%s2184_s3 + $0x168] sm:$0xff] }
 0x106   :  { %1587 = vmatpush3.bf16.msra.mxu1 %v1586_v41  ;;  %1557 = vmatprep.subr.bf16.mxu0 %v1556_v42  ;;  %v931_v41 = vld [vmem:[%s2184_s3 + $0x1e8] sm:$0xff]  ;;  %v1574_v42 = vpack.c.bf16 %v881_v33, %v880_v32  ;;  %v1610_v51 = vpack.c.bf16 %v915_v50, %v914_v48 }
 0x107   :  { %1589 = vmatprep.subr.bf16.mxu1 %v1588_v46  ;;  %v1608_v45 = vpack.c.bf16 %v931_v41, %v930_v40  ;;  %v882_v46 = vld [vmem:[%s2184_s3 + $0x60] sm:$0xff] }
 0x108   :  { %v1578_v49 = vpack.c.bf16 %v883_v47, %v882_v46 }
 0x109   :  { %1559 = vmatpush3.bf16.msra.mxu0 %v1558_v52  ;;  %v900_v52 = vld [vmem:[%s2184_s3 + $0xf0] sm:$0xff] }
 0x10a   :  { %1591 = vmatpush3.bf16.msra.mxu1 %v1590_v53  ;;  %1561 = vmatprep.subr.bf16.mxu0 %v1560_v54  ;;  %v901_v53 = vld [vmem:[%s2184_s3 + $0xf8] sm:$0xff]  ;;  %v932_v54 = vld [vmem:[%s2184_s3 + $0x1f0] sm:$0xff] }
 0x10b   :  { %1593 = vmatprep.subr.bf16.mxu1 %v1592_v25  ;;  %v1580_v55 = vpack.c.bf16 %v901_v53, %v900_v52  ;;  %v885_v25 = vld [vmem:[%s2184_s3 + $0x78] sm:$0xff]  ;;  %v1612_v58 = vpack.c.bf16 %v933_v56, %v932_v54  ;;  %s1825_s3 = smov [#allocation13]  }
 0x10c   :  { %v1582_v60 = vpack.c.bf16 %v885_v25, %v884_v57  ;;  %s1163_s2 = sshll.u32 %s1825_s3, 4  ;;  %s1164_s2 = int_to_ptr.vmem [resolvable:$true] %s1163_s2 }
 0x10d   :  { %1563 = vmatpush3.bf16.msra.mxu0 %v1562_v63  ;;  %v390_v63 = vld [vmem:[#allocation7] sm:$0xf]  ;;  %s1780_s13 = scalar_lea.vmem %s1164_s2, 16  ;;  %s1784_s14 = scalar_lea.vmem %s1164_s2, 32 }
 0x10e   :  { %1595 = vmatpush3.bf16.msra.mxu1 %v1594_v0  ;;  %1565 = vmatprep.subr.bf16.mxu0 %v1564_v1  ;;  %v420_v0 = vrot.slane %v390_v63, %v394_v11  ;;  %v428_v1 = vrot.slane %v390_v63, %v402_v35  ;;  %v424_v2 = vrot.slane %v390_v63, %v398_v8  ;;  %v1076_v8 = vld [vmem:[#allocation10] sm:$0xff]  ;;  %v1077_v35 = vld [vmem:[#allocation10 + $0x8] sm:$0xff]  ;;  %p1781_p6 = scmp.ne.s32.totalorder %s1164_s2, %s1780_s13  ;;  %p1785_p7 = scmp.lt.s32.totalorder %s1164_s2, %s1164_s2 }
 0x10f   :  { %1597 = vmatprep.subr.bf16.mxu1 %v1596_v5  ;;  %v432_v3 = vrot.slane %v390_v63, %v406_v23  ;;  %v1617_v59 = vpack.c.bf16 %v1077_v35, %v1076_v8  ;;  %v1823_v23 = vmov 0.0|0.0   ;;  %p1786_p8 = scmp.lt.s32.totalorder %s1784_s14, %s1780_s13 }
 0x111   :  { %1567 = vmatpush3.bf16.msra.mxu0 %v1566_v14  ;;  %p1787_p9 = por %p1786_p8, %p1785_p7 }
 0x112   :  { %1599 = vmatpush3.bf16.msra.mxu1 %v1598_v15  ;;  %1569 = vmatprep.subr.bf16.mxu0 %v1568_v16 }
 0x113   :  { %1601 = vmatprep.subr.bf16.mxu1 %v1600_v21  ;;  %v1620_v21 = vpack.c.bf16 %v1079_v19, %v1078_v18  ;;  %p1788_p10 = pnand %p1787_p9, %p1781_p6 }
 0x115   :  { %1571 = vmatpush3.bf16.msra.mxu0 %v1570_v29 }
 0x116   :  { %1603 = vmatpush3.bf16.msra.mxu1 %v1602_v30  ;;  %1573 = vmatprep.subr.bf16.mxu0 %v1572_v31 }
 0x117   :  { %1605 = vmatprep.subr.bf16.mxu1 %v1604_v36 }
 0x119   :  { %1575 = vmatpush3.bf16.msra.mxu0 %v1574_v42 }
 0x11a   :  { %1607 = vmatpush3.bf16.msra.mxu1 %v1606_v43  ;;  %1577 = vmatprep.subr.bf16.mxu0 %v1576_v44 }
 0x11b   :  { %1609 = vmatprep.subr.bf16.mxu1 %v1608_v45 }
 0x11d   :  { %1579 = vmatpush3.bf16.msra.mxu0 %v1578_v49 }
 0x11e   :  { %1611 = vmatpush3.bf16.msra.mxu1 %v1610_v51  ;;  %1581 = vmatprep.subr.bf16.mxu0 %v1580_v55 }
 0x11f   :  { %1613 = vmatprep.subr.bf16.mxu1 %v1612_v58 }
 0x121   :  { %1583 = vmatpush3.bf16.msra.mxu0 %v1582_v60 }
 0x122   :  { %1615 = vmatpush3.bf16.msra.mxu1 %v1614_v62  ;;  %1616 = vmatprep.subr.bf16.mxu0 %v1823_v23 }
 0x1d7   :  { %v648_v4 = vpop.f32.mrb[0].mxu0 }
 0x1d8   :  { %v1622_v5 = vadd.f32 %v648_v4, %v420_v0  ;;  %v861_v6 = vpop.f32.mrb[0].mxu1  ;;  %v650_v9 = vpop.f32.mrb[1].mxu0 }
 0x1d9   :  { %v1624_v10 = vadd.f32 %v861_v6, %v428_v1  ;;  %v1623_v12 = vadd.f32 %v650_v9, %v424_v2  ;;  %v863_v13 = vpop.f32.mrb[1].mxu1 }
 0x1da   :  { %v1625_v14 = vadd.f32 %v863_v13, %v432_v3  ;;  %v866_v16 = vmax.f32 %v1622_v5, 0.0 }
 0x1db   :  { %v867_v15 = vmax.f32 %v1623_v12, 0.0  ;;  %v868_v17 = vmax.f32 %v1624_v10, 0.0 }
 0x1dc   :  { %v869_v11 = vmax.f32 %v1625_v14, 0.0 }
 0x1dd   :  { %999 = vmatprep.mubr.f32.mxu0 %v867_v15 }
 0x1de   :  { %1069 = vmatprep.mubr.f32.mxu1 %v869_v11  ;;  %1000 = vmatmul.mubr.f32.vlgmr.msra.gmra.mrb[2].mxu0 %v866_v16 }
 0x1df   :  { %1070 = vmatmul.mubr.f32.vlgmr.msra.gmra.mrb[2].mxu1 %v868_v17  ;;  %1618 = vmatpush3.bf16.msra.mxu0 %v1617_v59 }
 0x1e0   :  { %1619 = vmatprep.subr.bf16.mxu0 %v1823_v23  ;;  %1261 = vmatprep.mubr.msk.f32.mxu0 %vm1824_vm1, %v1822_v7 }
 0x1e3   :  { %1621 = vmatpush3.bf16.msra.mxu0 %v1620_v21 }
 0x2b1   :  { %v1210_v22 = vpop.f32.mrb[2].mxu0 }
 0x2b2   :  { %v1245_v24 = vpop.f32.mrb[2].mxu1  ;;  %v1211_v27 = vpop.f32.mrb[3].mxu0 }
 0x2b3   :  { %v1212_v28 = vadd.f32 %v1211_v27, %v1210_v22  ;;  %v1246_v29 = vpop.f32.mrb[3].mxu1 }
 0x2b4   :  { %v1247_v30 = vadd.f32 %v1246_v29, %v1245_v24 }
 0x2b5   :  { %v1002_v31 = vadd.f32 %v1212_v28, %v934_v26 }
 0x2b7   :  { %v1072_v32 = vadd.f32 %v1247_v30, %v1002_v31 }
 0x2b9   :  { %v1075_v33 = vmax.f32 %v1072_v32, 0.0 }
 0x2bb   :  { %1262 = vmatmul.mubr.msk.f32.vlgmr.msra.gmra.mrb[4].mxu0 %vm1081_vm2, %v1075_v33 }
 0x38e   :  { %v1151_v36 = vpop.f32.mrb[4].mxu0 }
 0x38f   :  { %v1152_v37 = vadd.f32 %v1151_v36, %v1080_v34  ;;  %v1263_v38 = vpop.f32.mrb[5].mxu0 }
 0x391   :  { %1156 = vst.msk [vmem:[#allocation13] sm:$0x1] %vm1155_vm3, %v1152_v37 }
 0x392   :  { %1791 = shalt.err (!%p1788_p10)
}
 0x393   :  { %s1792_s16 = scalar_lea.hbm %s2188_s7, 16 }
 0x394   :  { %p1793_p11 = scmp.ne.s32.totalorder %s2188_s7, %s1792_s16  ;;  %p1796_p12 = scmp.lt.u32.totalorder %s1792_s16, %s2188_s7 }
 0x396   :  { %p1798_p13 = pnand %p1796_p12, %p1793_p11 }
 0x398   :  { %1801 = shalt.err (!%p1798_p13)
}
 0x399   :  { %1166 = dma.vmem_to_hbm [thread:$0]  %s1164_s2, 16, %s2188_s7, [#allocation4]  }
 0x39a   :  { %1810 = dma.done.wait [#allocation4], 16  }
 0x39b   :  { %1811 = vsyncadd [#allocation4], 4294967280 }
 0x39c   :  { %1170 = vsyncpa [#allocation3], 1 }
 0x39d   :  { %1171 = vsyncpa [#allocation6], 1 }
 0x39e   :  { %1172 = vsyncpa [#allocation9], 1 }
 0x39f   :  { %1173 = vsyncpa [#allocation12], 1 }
 0x3a0   :  { %1174 = vsyncpa [#allocation4], 1 }

</bundles_post_ra>
